<compile_context>
chip_gen: v7x
topology: tpu7x:2x2x1
jax: 0.10.0
libtpu: 0.0.40
codegen_flags: <defaults>
</compile_context>

<pallas_src>
import numpy as np
import jax
import jax.numpy as jnp
from jax.experimental import pallas as pl
from jax.experimental.pallas import tpu as pltpu


_TARGET_BLOCK_ELEMS = 256 * 1024       # ~1 MiB of f32 per (B, HW) input block
_VMEM_LIMIT_BYTES = 32 * 1024 * 1024   # <= v7x scoped default, << v5e/v6e physical


def make_equalize(H, W, *, im_size=None, segments=20, eps=1e-5, max_=255.0,
                  slope=0.1):
    """Build a jit-able equalize: (N, C, H, W) float32 -> (N, C, H, W) float32."""
    if not slope > 0:
        raise ValueError("Slope must be > 0.")
    if im_size is None:
        im_size = H  # module contract: square im_size x im_size images
    HW = H * W

    grid_vals = np.linspace(0.0, float(max_), segments + 1).astype(np.float32)
    slope_f = np.float32(slope)
    eps_f = np.float32(eps)
    max_f = np.float32(max_)
    inv_area = np.float32(1.0 / float(im_size) ** 2)   # exact for pow-2 im_size
    inv_delta = np.float32(float(segments) / float(max_))   # 1 / grid spacing
    # 0.5 + slope*grid[i]: slope multiply hoisted out of every soft term
    # (slope*relu(0.5/slope + g - ch) == relu((0.5 + slope*g) - slope*ch)).
    shg = [np.float32(np.float32(0.5) + slope_f * g) for g in grid_vals]
    # Largest f32 strictly below max_ (guards the strict `< max_` segment
    # boundary against non-IEEE TPU division rounding; see header).
    below_max = np.float32(np.nextafter(max_f, np.float32(0.0)))

    # Equivalence guard for masking on the original rescaled values (header).
    if HW / float(im_size) ** 2 > float(grid_vals[1]):
        raise ValueError("H*W / im_size**2 must be <= grid[1] for this kernel.")

    def kernel(x_ref, o_ref):
        x = x_ref[...]                                   # (B, HW) float32
        mn = jnp.min(x, axis=-1, keepdims=True)          # (B, 1)
        mx = jnp.max(x, axis=-1, keepdims=True)          # (B, 1)
        scale = max_f / (mx - mn + eps_f)                # one divide per row
        ch = jnp.minimum((x - mn) * scale, below_max)    # rescaled to [0, max_)

        # Soft-CDF estimate at the segments+1 grid points.  Each term is
        # reduced to (B, 1) immediately (no 21x concatenation buffer); the
        # lower clip is redundant because relu output is already >= 0.
        sch = slope_f * ch                               # hoisted slope multiply
        F = []
        for c in shg:
            soft = jnp.minimum(jnp.maximum(c - sch, 0.0), 1.0)
            F.append(jnp.sum(soft, axis=-1, keepdims=True) * inv_area)  # (B,1)
        # TODO(synk): for very large HW (e.g. 224x224) accumulate these sums
        # over HW chunks (two-pass) instead of holding full (B, HW) temps.

        # Piecewise-linear remap through the estimated CDF.  Strict-inequality
        # masks on the rescaled values (pixels exactly on grid points are left
        # untouched, like the reference).  Uniform grid spacing is a
        # compile-time constant, so the per-segment divide is a multiply.
        out = ch
        for i in range(segments):
            g0 = grid_vals[i]
            g1 = grid_vals[i + 1]
            m = (F[i + 1] - F[i]) * inv_delta            # (B, 1)
            b = F[i] - m * g0                            # (B, 1)
            out = jnp.where((ch > g0) & (ch < g1), m * ch + b, out)

        # Final per-channel rescale back to [0, max_].
        mn2 = jnp.min(out, axis=-1, keepdims=True)
        mx2 = jnp.max(out, axis=-1, keepdims=True)
        o_ref[...] = (out - mn2) * (max_f / (mx2 - mn2 + eps_f))

    def _choose_block_rows(rows_p):
        # Target ~256K elements per step; keep B a multiple of 8; when there
        # are >= 16 rows, force at least 2 grid steps so the "parallel" axis
        # shards across both v7x TensorCores (neutral on 1-TC v5e/v6e).
        cap = max(8, (_TARGET_BLOCK_ELEMS // HW) // 8 * 8)
        if rows_p >= 16:
            return max(8, min(cap, (rows_p // 2) // 8 * 8))
        return rows_p  # == 8: a single step is unavoidable without pure waste

    def equalize(img):
        img = jnp.asarray(img, jnp.float32)
        N, C, h, w = img.shape
        if (h, w) != (H, W):
            raise ValueError(f"expected spatial ({H},{W}), got ({h},{w})")
        rows = N * C
        x = img.reshape(rows, HW)
        # Pad the channel axis so the sublane block dim is a multiple of 8 and
        # divides the padded row count.  Zero rows are harmless (eps keeps all
        # divisions finite) and are sliced off afterwards.
        rows_p = -(-rows // 8) * 8
        B = _choose_block_rows(rows_p)
        rows_pp = -(-rows_p // B) * B
        if rows_pp != rows:
            x = jnp.pad(x, ((0, rows_pp - rows), (0, 0)))
        out = pl.pallas_call(
            kernel,
            out_shape=jax.ShapeDtypeStruct((rows_pp, HW), jnp.float32),
            grid=(rows_pp // B,),
            in_specs=[pl.BlockSpec((B, HW), lambda i: (i, 0))],
            out_specs=pl.BlockSpec((B, HW), lambda i: (i, 0)),
            compiler_params=pltpu.CompilerParams(
                dimension_semantics=("parallel",),
                vmem_limit_bytes=_VMEM_LIMIT_BYTES),
        )(x)
        return out[:rows].reshape(N, C, H, W)

    return jax.jit(equalize)


def equalize_ref_np(img, *, im_size, segments=20, eps=1e-5, max_=255.0, slope=0.1):
    """Pure-numpy mirror of the PyTorch Equalize forward (incl. in-place updates)."""
    img = np.asarray(img, np.float32)
    grid = np.linspace(0.0, float(max_), segments + 1).astype(np.float32)
    half = np.float32(0.5 / float(slope))
    N, C, H, W = img.shape
    out = np.empty_like(img)
    for n in range(N):
        for c in range(C):
            ch = img[n, c]
            ch = np.float32(max_) * (ch - ch.min()) / (ch.max() - ch.min() + np.float32(eps))
            flat = ch.ravel().copy()
            F_hat = np.zeros(segments + 1, np.float32)
            for i in range(segments + 1):
                soft = np.clip(np.float32(slope) * np.maximum(half + grid[i] - flat, 0.0),
                               0.0, 1.0)
                F_hat[i] = soft.sum() / float(im_size) ** 2
            for i in range(segments):
                mask = (flat > grid[i]) & (flat < grid[i + 1])
                m = (F_hat[i + 1] - F_hat[i]) / (grid[i + 1] - grid[i])
                b = F_hat[i] - m * grid[i]
                flat[mask] = m * flat[mask] + b
            ch2 = flat.reshape(H, W)
            out[n, c] = np.float32(max_) * (ch2 - ch2.min()) / (ch2.max() - ch2.min() + np.float32(eps))
    return out


if __name__ == "__main__":
    H, W = 16, 16
    eq = make_equalize(H, W, im_size=H, segments=20, eps=1e-5, max_=255.0, slope=0.1)

    # Case 1: module-spec demo shapes (8 rows -> single grid step).
    # Normalized float image in [0, 1): the module rescales each channel to
    # [0, max_] internally anyway; this keeps the reference's strict `< max_`
    # boundary numerically well defined (see header of previous revision).
    N, C = 2, 4
    img = jax.random.uniform(jax.random.PRNGKey(0), (N, C, H, W), dtype=jnp.float32)
    out = jax.block_until_ready(eq(img))
    ref = equalize_ref_np(np.asarray(img), im_size=H)
    np.testing.assert_allclose(np.asarray(out), ref, rtol=2e-3, atol=1e-1)
    assert out.shape == (N, C, H, W)

    # Case 2: enough channels for a multi-step grid (rows=64 -> B=32, grid=2),
    # exercising dual-TC sharding on v7x and pipeline overlap on v5e/v6e.
    N2, C2 = 16, 4
    img2 = jax.random.uniform(jax.random.PRNGKey(1), (N2, C2, H, W), dtype=jnp.float32)
    out2 = jax.block_until_ready(eq(img2))
    ref2 = equalize_ref_np(np.asarray(img2), im_size=H)
    np.testing.assert_allclose(np.asarray(out2), ref2, rtol=2e-3, atol=1e-1)
    assert out2.shape == (N2, C2, H, W)

    print("KERNEL_OK")
</pallas_src>

<mosaic_0001>
module attributes {stable_mosaic.version = 11 : i64} {
  func.func @kernel(%arg0: i32, %arg1: memref<8x256xf32, #tpu.memory_space<vmem>>, %arg2: memref<8x256xf32, #tpu.memory_space<vmem>>) attributes {dimension_semantics = [#tpu.dimension_semantics<parallel>], iteration_bounds = array<i64: 1>, scalar_prefetch = 0 : i64, scratch_operands = 0 : i64, tpu.core_type = #tpu.core_type<tc>, window_params = [{transform_indices = @transform_0, window_bounds = array<i64: 8, 256>}, {transform_indices = @transform_1, window_bounds = array<i64: 8, 256>}]} {
    %c0 = arith.constant 0 : index
    %c0_0 = arith.constant 0 : index
    %0 = vector.load %arg1[%c0, %c0_0] : memref<8x256xf32, #tpu.memory_space<vmem>>, vector<8x256xf32>
    %cst = arith.constant dense<0x7F800000> : vector<8xf32>
    %1 = vector.multi_reduction <minimumf>, %0, %cst [1] : vector<8x256xf32> to vector<8xf32>
    %2 = vector.shape_cast %1 : vector<8xf32> to vector<8x1xf32>
    %cst_1 = arith.constant dense<0xFF800000> : vector<8xf32>
    %3 = vector.multi_reduction <maximumf>, %0, %cst_1 [1] : vector<8x256xf32> to vector<8xf32>
    %4 = vector.shape_cast %3 : vector<8xf32> to vector<8x1xf32>
    %5 = arith.subf %4, %2 : vector<8x1xf32>
    %cst_2 = arith.constant 9.99999974E-6 : f32
    %6 = vector.broadcast %cst_2 : f32 to vector<8x1xf32>
    %7 = arith.addf %5, %6 : vector<8x1xf32>
    %cst_3 = arith.constant 2.550000e+02 : f32
    %8 = vector.broadcast %cst_3 : f32 to vector<8x1xf32>
    %9 = arith.divf %8, %7 : vector<8x1xf32>
    %10 = vector.broadcast %2 : vector<8x1xf32> to vector<8x256xf32>
    %11 = arith.subf %0, %10 : vector<8x256xf32>
    %12 = vector.broadcast %9 : vector<8x1xf32> to vector<8x256xf32>
    %13 = arith.mulf %11, %12 : vector<8x256xf32>
    %cst_4 = arith.constant 254.999985 : f32
    %14 = vector.broadcast %cst_4 : f32 to vector<8x256xf32>
    %15 = arith.minimumf %13, %14 : vector<8x256xf32>
    %cst_5 = arith.constant 1.000000e-01 : f32
    %16 = vector.broadcast %cst_5 : f32 to vector<8x256xf32>
    %17 = arith.mulf %16, %15 : vector<8x256xf32>
    %cst_6 = arith.constant 5.000000e-01 : f32
    %18 = vector.broadcast %cst_6 : f32 to vector<8x256xf32>
    %19 = arith.subf %18, %17 : vector<8x256xf32>
    %cst_7 = arith.constant 0.000000e+00 : f32
    %20 = vector.broadcast %cst_7 : f32 to vector<8x256xf32>
    %21 = arith.maximumf %19, %20 : vector<8x256xf32>
    %cst_8 = arith.constant 1.000000e+00 : f32
    %22 = vector.broadcast %cst_8 : f32 to vector<8x256xf32>
    %23 = arith.minimumf %21, %22 : vector<8x256xf32>
    %cst_9 = arith.constant dense<0.000000e+00> : vector<8xf32>
    %24 = vector.multi_reduction <add>, %23, %cst_9 [1] : vector<8x256xf32> to vector<8xf32>
    %25 = vector.shape_cast %24 : vector<8xf32> to vector<8x1xf32>
    %cst_10 = arith.constant 3.906250e-03 : f32
    %26 = vector.broadcast %cst_10 : f32 to vector<8x1xf32>
    %27 = arith.mulf %25, %26 : vector<8x1xf32>
    %cst_11 = arith.constant 1.775000e+00 : f32
    %28 = vector.broadcast %cst_11 : f32 to vector<8x256xf32>
    %29 = arith.subf %28, %17 : vector<8x256xf32>
    %cst_12 = arith.constant 0.000000e+00 : f32
    %30 = vector.broadcast %cst_12 : f32 to vector<8x256xf32>
    %31 = arith.maximumf %29, %30 : vector<8x256xf32>
    %cst_13 = arith.constant 1.000000e+00 : f32
    %32 = vector.broadcast %cst_13 : f32 to vector<8x256xf32>
    %33 = arith.minimumf %31, %32 : vector<8x256xf32>
    %cst_14 = arith.constant dense<0.000000e+00> : vector<8xf32>
    %34 = vector.multi_reduction <add>, %33, %cst_14 [1] : vector<8x256xf32> to vector<8xf32>
    %35 = vector.shape_cast %34 : vector<8xf32> to vector<8x1xf32>
    %cst_15 = arith.constant 3.906250e-03 : f32
    %36 = vector.broadcast %cst_15 : f32 to vector<8x1xf32>
    %37 = arith.mulf %35, %36 : vector<8x1xf32>
    %cst_16 = arith.constant 3.050000e+00 : f32
    %38 = vector.broadcast %cst_16 : f32 to vector<8x256xf32>
    %39 = arith.subf %38, %17 : vector<8x256xf32>
    %cst_17 = arith.constant 0.000000e+00 : f32
    %40 = vector.broadcast %cst_17 : f32 to vector<8x256xf32>
    %41 = arith.maximumf %39, %40 : vector<8x256xf32>
    %cst_18 = arith.constant 1.000000e+00 : f32
    %42 = vector.broadcast %cst_18 : f32 to vector<8x256xf32>
    %43 = arith.minimumf %41, %42 : vector<8x256xf32>
    %cst_19 = arith.constant dense<0.000000e+00> : vector<8xf32>
    %44 = vector.multi_reduction <add>, %43, %cst_19 [1] : vector<8x256xf32> to vector<8xf32>
    %45 = vector.shape_cast %44 : vector<8xf32> to vector<8x1xf32>
    %cst_20 = arith.constant 3.906250e-03 : f32
    %46 = vector.broadcast %cst_20 : f32 to vector<8x1xf32>
    %47 = arith.mulf %45, %46 : vector<8x1xf32>
    %cst_21 = arith.constant 4.325000e+00 : f32
    %48 = vector.broadcast %cst_21 : f32 to vector<8x256xf32>
    %49 = arith.subf %48, %17 : vector<8x256xf32>
    %cst_22 = arith.constant 0.000000e+00 : f32
    %50 = vector.broadcast %cst_22 : f32 to vector<8x256xf32>
    %51 = arith.maximumf %49, %50 : vector<8x256xf32>
    %cst_23 = arith.constant 1.000000e+00 : f32
    %52 = vector.broadcast %cst_23 : f32 to vector<8x256xf32>
    %53 = arith.minimumf %51, %52 : vector<8x256xf32>
    %cst_24 = arith.constant dense<0.000000e+00> : vector<8xf32>
    %54 = vector.multi_reduction <add>, %53, %cst_24 [1] : vector<8x256xf32> to vector<8xf32>
    %55 = vector.shape_cast %54 : vector<8xf32> to vector<8x1xf32>
    %cst_25 = arith.constant 3.906250e-03 : f32
    %56 = vector.broadcast %cst_25 : f32 to vector<8x1xf32>
    %57 = arith.mulf %55, %56 : vector<8x1xf32>
    %cst_26 = arith.constant 5.600000e+00 : f32
    %58 = vector.broadcast %cst_26 : f32 to vector<8x256xf32>
    %59 = arith.subf %58, %17 : vector<8x256xf32>
    %cst_27 = arith.constant 0.000000e+00 : f32
    %60 = vector.broadcast %cst_27 : f32 to vector<8x256xf32>
    %61 = arith.maximumf %59, %60 : vector<8x256xf32>
    %cst_28 = arith.constant 1.000000e+00 : f32
    %62 = vector.broadcast %cst_28 : f32 to vector<8x256xf32>
    %63 = arith.minimumf %61, %62 : vector<8x256xf32>
    %cst_29 = arith.constant dense<0.000000e+00> : vector<8xf32>
    %64 = vector.multi_reduction <add>, %63, %cst_29 [1] : vector<8x256xf32> to vector<8xf32>
    %65 = vector.shape_cast %64 : vector<8xf32> to vector<8x1xf32>
    %cst_30 = arith.constant 3.906250e-03 : f32
    %66 = vector.broadcast %cst_30 : f32 to vector<8x1xf32>
    %67 = arith.mulf %65, %66 : vector<8x1xf32>
    %cst_31 = arith.constant 6.875000e+00 : f32
    %68 = vector.broadcast %cst_31 : f32 to vector<8x256xf32>
    %69 = arith.subf %68, %17 : vector<8x256xf32>
    %cst_32 = arith.constant 0.000000e+00 : f32
    %70 = vector.broadcast %cst_32 : f32 to vector<8x256xf32>
    %71 = arith.maximumf %69, %70 : vector<8x256xf32>
    %cst_33 = arith.constant 1.000000e+00 : f32
    %72 = vector.broadcast %cst_33 : f32 to vector<8x256xf32>
    %73 = arith.minimumf %71, %72 : vector<8x256xf32>
    %cst_34 = arith.constant dense<0.000000e+00> : vector<8xf32>
    %74 = vector.multi_reduction <add>, %73, %cst_34 [1] : vector<8x256xf32> to vector<8xf32>
    %75 = vector.shape_cast %74 : vector<8xf32> to vector<8x1xf32>
    %cst_35 = arith.constant 3.906250e-03 : f32
    %76 = vector.broadcast %cst_35 : f32 to vector<8x1xf32>
    %77 = arith.mulf %75, %76 : vector<8x1xf32>
    %cst_36 = arith.constant 8.14999961 : f32
    %78 = vector.broadcast %cst_36 : f32 to vector<8x256xf32>
    %79 = arith.subf %78, %17 : vector<8x256xf32>
    %cst_37 = arith.constant 0.000000e+00 : f32
    %80 = vector.broadcast %cst_37 : f32 to vector<8x256xf32>
    %81 = arith.maximumf %79, %80 : vector<8x256xf32>
    %cst_38 = arith.constant 1.000000e+00 : f32
    %82 = vector.broadcast %cst_38 : f32 to vector<8x256xf32>
    %83 = arith.minimumf %81, %82 : vector<8x256xf32>
    %cst_39 = arith.constant dense<0.000000e+00> : vector<8xf32>
    %84 = vector.multi_reduction <add>, %83, %cst_39 [1] : vector<8x256xf32> to vector<8xf32>
    %85 = vector.shape_cast %84 : vector<8xf32> to vector<8x1xf32>
    %cst_40 = arith.constant 3.906250e-03 : f32
    %86 = vector.broadcast %cst_40 : f32 to vector<8x1xf32>
    %87 = arith.mulf %85, %86 : vector<8x1xf32>
    %cst_41 = arith.constant 9.425000e+00 : f32
    %88 = vector.broadcast %cst_41 : f32 to vector<8x256xf32>
    %89 = arith.subf %88, %17 : vector<8x256xf32>
    %cst_42 = arith.constant 0.000000e+00 : f32
    %90 = vector.broadcast %cst_42 : f32 to vector<8x256xf32>
    %91 = arith.maximumf %89, %90 : vector<8x256xf32>
    %cst_43 = arith.constant 1.000000e+00 : f32
    %92 = vector.broadcast %cst_43 : f32 to vector<8x256xf32>
    %93 = arith.minimumf %91, %92 : vector<8x256xf32>
    %cst_44 = arith.constant dense<0.000000e+00> : vector<8xf32>
    %94 = vector.multi_reduction <add>, %93, %cst_44 [1] : vector<8x256xf32> to vector<8xf32>
    %95 = vector.shape_cast %94 : vector<8xf32> to vector<8x1xf32>
    %cst_45 = arith.constant 3.906250e-03 : f32
    %96 = vector.broadcast %cst_45 : f32 to vector<8x1xf32>
    %97 = arith.mulf %95, %96 : vector<8x1xf32>
    %cst_46 = arith.constant 1.070000e+01 : f32
    %98 = vector.broadcast %cst_46 : f32 to vector<8x256xf32>
    %99 = arith.subf %98, %17 : vector<8x256xf32>
    %cst_47 = arith.constant 0.000000e+00 : f32
    %100 = vector.broadcast %cst_47 : f32 to vector<8x256xf32>
    %101 = arith.maximumf %99, %100 : vector<8x256xf32>
    %cst_48 = arith.constant 1.000000e+00 : f32
    %102 = vector.broadcast %cst_48 : f32 to vector<8x256xf32>
    %103 = arith.minimumf %101, %102 : vector<8x256xf32>
    %cst_49 = arith.constant dense<0.000000e+00> : vector<8xf32>
    %104 = vector.multi_reduction <add>, %103, %cst_49 [1] : vector<8x256xf32> to vector<8xf32>
    %105 = vector.shape_cast %104 : vector<8xf32> to vector<8x1xf32>
    %cst_50 = arith.constant 3.906250e-03 : f32
    %106 = vector.broadcast %cst_50 : f32 to vector<8x1xf32>
    %107 = arith.mulf %105, %106 : vector<8x1xf32>
    %cst_51 = arith.constant 1.197500e+01 : f32
    %108 = vector.broadcast %cst_51 : f32 to vector<8x256xf32>
    %109 = arith.subf %108, %17 : vector<8x256xf32>
    %cst_52 = arith.constant 0.000000e+00 : f32
    %110 = vector.broadcast %cst_52 : f32 to vector<8x256xf32>
    %111 = arith.maximumf %109, %110 : vector<8x256xf32>
    %cst_53 = arith.constant 1.000000e+00 : f32
    %112 = vector.broadcast %cst_53 : f32 to vector<8x256xf32>
    %113 = arith.minimumf %111, %112 : vector<8x256xf32>
    %cst_54 = arith.constant dense<0.000000e+00> : vector<8xf32>
    %114 = vector.multi_reduction <add>, %113, %cst_54 [1] : vector<8x256xf32> to vector<8xf32>
    %115 = vector.shape_cast %114 : vector<8xf32> to vector<8x1xf32>
    %cst_55 = arith.constant 3.906250e-03 : f32
    %116 = vector.broadcast %cst_55 : f32 to vector<8x1xf32>
    %117 = arith.mulf %115, %116 : vector<8x1xf32>
    %cst_56 = arith.constant 1.325000e+01 : f32
    %118 = vector.broadcast %cst_56 : f32 to vector<8x256xf32>
    %119 = arith.subf %118, %17 : vector<8x256xf32>
    %cst_57 = arith.constant 0.000000e+00 : f32
    %120 = vector.broadcast %cst_57 : f32 to vector<8x256xf32>
    %121 = arith.maximumf %119, %120 : vector<8x256xf32>
    %cst_58 = arith.constant 1.000000e+00 : f32
    %122 = vector.broadcast %cst_58 : f32 to vector<8x256xf32>
    %123 = arith.minimumf %121, %122 : vector<8x256xf32>
    %cst_59 = arith.constant dense<0.000000e+00> : vector<8xf32>
    %124 = vector.multi_reduction <add>, %123, %cst_59 [1] : vector<8x256xf32> to vector<8xf32>
    %125 = vector.shape_cast %124 : vector<8xf32> to vector<8x1xf32>
    %cst_60 = arith.constant 3.906250e-03 : f32
    %126 = vector.broadcast %cst_60 : f32 to vector<8x1xf32>
    %127 = arith.mulf %125, %126 : vector<8x1xf32>
    %cst_61 = arith.constant 14.5250006 : f32
    %128 = vector.broadcast %cst_61 : f32 to vector<8x256xf32>
    %129 = arith.subf %128, %17 : vector<8x256xf32>
    %cst_62 = arith.constant 0.000000e+00 : f32
    %130 = vector.broadcast %cst_62 : f32 to vector<8x256xf32>
    %131 = arith.maximumf %129, %130 : vector<8x256xf32>
    %cst_63 = arith.constant 1.000000e+00 : f32
    %132 = vector.broadcast %cst_63 : f32 to vector<8x256xf32>
    %133 = arith.minimumf %131, %132 : vector<8x256xf32>
    %cst_64 = arith.constant dense<0.000000e+00> : vector<8xf32>
    %134 = vector.multi_reduction <add>, %133, %cst_64 [1] : vector<8x256xf32> to vector<8xf32>
    %135 = vector.shape_cast %134 : vector<8xf32> to vector<8x1xf32>
    %cst_65 = arith.constant 3.906250e-03 : f32
    %136 = vector.broadcast %cst_65 : f32 to vector<8x1xf32>
    %137 = arith.mulf %135, %136 : vector<8x1xf32>
    %cst_66 = arith.constant 1.580000e+01 : f32
    %138 = vector.broadcast %cst_66 : f32 to vector<8x256xf32>
    %139 = arith.subf %138, %17 : vector<8x256xf32>
    %cst_67 = arith.constant 0.000000e+00 : f32
    %140 = vector.broadcast %cst_67 : f32 to vector<8x256xf32>
    %141 = arith.maximumf %139, %140 : vector<8x256xf32>
    %cst_68 = arith.constant 1.000000e+00 : f32
    %142 = vector.broadcast %cst_68 : f32 to vector<8x256xf32>
    %143 = arith.minimumf %141, %142 : vector<8x256xf32>
    %cst_69 = arith.constant dense<0.000000e+00> : vector<8xf32>
    %144 = vector.multi_reduction <add>, %143, %cst_69 [1] : vector<8x256xf32> to vector<8xf32>
    %145 = vector.shape_cast %144 : vector<8xf32> to vector<8x1xf32>
    %cst_70 = arith.constant 3.906250e-03 : f32
    %146 = vector.broadcast %cst_70 : f32 to vector<8x1xf32>
    %147 = arith.mulf %145, %146 : vector<8x1xf32>
    %cst_71 = arith.constant 1.707500e+01 : f32
    %148 = vector.broadcast %cst_71 : f32 to vector<8x256xf32>
    %149 = arith.subf %148, %17 : vector<8x256xf32>
    %cst_72 = arith.constant 0.000000e+00 : f32
    %150 = vector.broadcast %cst_72 : f32 to vector<8x256xf32>
    %151 = arith.maximumf %149, %150 : vector<8x256xf32>
    %cst_73 = arith.constant 1.000000e+00 : f32
    %152 = vector.broadcast %cst_73 : f32 to vector<8x256xf32>
    %153 = arith.minimumf %151, %152 : vector<8x256xf32>
    %cst_74 = arith.constant dense<0.000000e+00> : vector<8xf32>
    %154 = vector.multi_reduction <add>, %153, %cst_74 [1] : vector<8x256xf32> to vector<8xf32>
    %155 = vector.shape_cast %154 : vector<8xf32> to vector<8x1xf32>
    %cst_75 = arith.constant 3.906250e-03 : f32
    %156 = vector.broadcast %cst_75 : f32 to vector<8x1xf32>
    %157 = arith.mulf %155, %156 : vector<8x1xf32>
    %cst_76 = arith.constant 1.835000e+01 : f32
    %158 = vector.broadcast %cst_76 : f32 to vector<8x256xf32>
    %159 = arith.subf %158, %17 : vector<8x256xf32>
    %cst_77 = arith.constant 0.000000e+00 : f32
    %160 = vector.broadcast %cst_77 : f32 to vector<8x256xf32>
    %161 = arith.maximumf %159, %160 : vector<8x256xf32>
    %cst_78 = arith.constant 1.000000e+00 : f32
    %162 = vector.broadcast %cst_78 : f32 to vector<8x256xf32>
    %163 = arith.minimumf %161, %162 : vector<8x256xf32>
    %cst_79 = arith.constant dense<0.000000e+00> : vector<8xf32>
    %164 = vector.multi_reduction <add>, %163, %cst_79 [1] : vector<8x256xf32> to vector<8xf32>
    %165 = vector.shape_cast %164 : vector<8xf32> to vector<8x1xf32>
    %cst_80 = arith.constant 3.906250e-03 : f32
    %166 = vector.broadcast %cst_80 : f32 to vector<8x1xf32>
    %167 = arith.mulf %165, %166 : vector<8x1xf32>
    %cst_81 = arith.constant 1.962500e+01 : f32
    %168 = vector.broadcast %cst_81 : f32 to vector<8x256xf32>
    %169 = arith.subf %168, %17 : vector<8x256xf32>
    %cst_82 = arith.constant 0.000000e+00 : f32
    %170 = vector.broadcast %cst_82 : f32 to vector<8x256xf32>
    %171 = arith.maximumf %169, %170 : vector<8x256xf32>
    %cst_83 = arith.constant 1.000000e+00 : f32
    %172 = vector.broadcast %cst_83 : f32 to vector<8x256xf32>
    %173 = arith.minimumf %171, %172 : vector<8x256xf32>
    %cst_84 = arith.constant dense<0.000000e+00> : vector<8xf32>
    %174 = vector.multi_reduction <add>, %173, %cst_84 [1] : vector<8x256xf32> to vector<8xf32>
    %175 = vector.shape_cast %174 : vector<8xf32> to vector<8x1xf32>
    %cst_85 = arith.constant 3.906250e-03 : f32
    %176 = vector.broadcast %cst_85 : f32 to vector<8x1xf32>
    %177 = arith.mulf %175, %176 : vector<8x1xf32>
    %cst_86 = arith.constant 2.090000e+01 : f32
    %178 = vector.broadcast %cst_86 : f32 to vector<8x256xf32>
    %179 = arith.subf %178, %17 : vector<8x256xf32>
    %cst_87 = arith.constant 0.000000e+00 : f32
    %180 = vector.broadcast %cst_87 : f32 to vector<8x256xf32>
    %181 = arith.maximumf %179, %180 : vector<8x256xf32>
    %cst_88 = arith.constant 1.000000e+00 : f32
    %182 = vector.broadcast %cst_88 : f32 to vector<8x256xf32>
    %183 = arith.minimumf %181, %182 : vector<8x256xf32>
    %cst_89 = arith.constant dense<0.000000e+00> : vector<8xf32>
    %184 = vector.multi_reduction <add>, %183, %cst_89 [1] : vector<8x256xf32> to vector<8xf32>
    %185 = vector.shape_cast %184 : vector<8xf32> to vector<8x1xf32>
    %cst_90 = arith.constant 3.906250e-03 : f32
    %186 = vector.broadcast %cst_90 : f32 to vector<8x1xf32>
    %187 = arith.mulf %185, %186 : vector<8x1xf32>
    %cst_91 = arith.constant 22.1750011 : f32
    %188 = vector.broadcast %cst_91 : f32 to vector<8x256xf32>
    %189 = arith.subf %188, %17 : vector<8x256xf32>
    %cst_92 = arith.constant 0.000000e+00 : f32
    %190 = vector.broadcast %cst_92 : f32 to vector<8x256xf32>
    %191 = arith.maximumf %189, %190 : vector<8x256xf32>
    %cst_93 = arith.constant 1.000000e+00 : f32
    %192 = vector.broadcast %cst_93 : f32 to vector<8x256xf32>
    %193 = arith.minimumf %191, %192 : vector<8x256xf32>
    %cst_94 = arith.constant dense<0.000000e+00> : vector<8xf32>
    %194 = vector.multi_reduction <add>, %193, %cst_94 [1] : vector<8x256xf32> to vector<8xf32>
    %195 = vector.shape_cast %194 : vector<8xf32> to vector<8x1xf32>
    %cst_95 = arith.constant 3.906250e-03 : f32
    %196 = vector.broadcast %cst_95 : f32 to vector<8x1xf32>
    %197 = arith.mulf %195, %196 : vector<8x1xf32>
    %cst_96 = arith.constant 2.345000e+01 : f32
    %198 = vector.broadcast %cst_96 : f32 to vector<8x256xf32>
    %199 = arith.subf %198, %17 : vector<8x256xf32>
    %cst_97 = arith.constant 0.000000e+00 : f32
    %200 = vector.broadcast %cst_97 : f32 to vector<8x256xf32>
    %201 = arith.maximumf %199, %200 : vector<8x256xf32>
    %cst_98 = arith.constant 1.000000e+00 : f32
    %202 = vector.broadcast %cst_98 : f32 to vector<8x256xf32>
    %203 = arith.minimumf %201, %202 : vector<8x256xf32>
    %cst_99 = arith.constant dense<0.000000e+00> : vector<8xf32>
    %204 = vector.multi_reduction <add>, %203, %cst_99 [1] : vector<8x256xf32> to vector<8xf32>
    %205 = vector.shape_cast %204 : vector<8xf32> to vector<8x1xf32>
    %cst_100 = arith.constant 3.906250e-03 : f32
    %206 = vector.broadcast %cst_100 : f32 to vector<8x1xf32>
    %207 = arith.mulf %205, %206 : vector<8x1xf32>
    %cst_101 = arith.constant 2.472500e+01 : f32
    %208 = vector.broadcast %cst_101 : f32 to vector<8x256xf32>
    %209 = arith.subf %208, %17 : vector<8x256xf32>
    %cst_102 = arith.constant 0.000000e+00 : f32
    %210 = vector.broadcast %cst_102 : f32 to vector<8x256xf32>
    %211 = arith.maximumf %209, %210 : vector<8x256xf32>
    %cst_103 = arith.constant 1.000000e+00 : f32
    %212 = vector.broadcast %cst_103 : f32 to vector<8x256xf32>
    %213 = arith.minimumf %211, %212 : vector<8x256xf32>
    %cst_104 = arith.constant dense<0.000000e+00> : vector<8xf32>
    %214 = vector.multi_reduction <add>, %213, %cst_104 [1] : vector<8x256xf32> to vector<8xf32>
    %215 = vector.shape_cast %214 : vector<8xf32> to vector<8x1xf32>
    %cst_105 = arith.constant 3.906250e-03 : f32
    %216 = vector.broadcast %cst_105 : f32 to vector<8x1xf32>
    %217 = arith.mulf %215, %216 : vector<8x1xf32>
    %cst_106 = arith.constant 2.600000e+01 : f32
    %218 = vector.broadcast %cst_106 : f32 to vector<8x256xf32>
    %219 = arith.subf %218, %17 : vector<8x256xf32>
    %cst_107 = arith.constant 0.000000e+00 : f32
    %220 = vector.broadcast %cst_107 : f32 to vector<8x256xf32>
    %221 = arith.maximumf %219, %220 : vector<8x256xf32>
    %cst_108 = arith.constant 1.000000e+00 : f32
    %222 = vector.broadcast %cst_108 : f32 to vector<8x256xf32>
    %223 = arith.minimumf %221, %222 : vector<8x256xf32>
    %cst_109 = arith.constant dense<0.000000e+00> : vector<8xf32>
    %224 = vector.multi_reduction <add>, %223, %cst_109 [1] : vector<8x256xf32> to vector<8xf32>
    %225 = vector.shape_cast %224 : vector<8xf32> to vector<8x1xf32>
    %cst_110 = arith.constant 3.906250e-03 : f32
    %226 = vector.broadcast %cst_110 : f32 to vector<8x1xf32>
    %227 = arith.mulf %225, %226 : vector<8x1xf32>
    %228 = arith.subf %37, %27 : vector<8x1xf32>
    %cst_111 = arith.constant 0.0784313753 : f32
    %229 = vector.broadcast %cst_111 : f32 to vector<8x1xf32>
    %230 = arith.mulf %228, %229 : vector<8x1xf32>
    %cst_112 = arith.constant 0.000000e+00 : f32
    %231 = vector.broadcast %cst_112 : f32 to vector<8x1xf32>
    %232 = arith.mulf %230, %231 : vector<8x1xf32>
    %233 = arith.subf %27, %232 : vector<8x1xf32>
    %cst_113 = arith.constant 0.000000e+00 : f32
    %234 = vector.broadcast %cst_113 : f32 to vector<8x256xf32>
    %235 = arith.cmpf ogt, %15, %234 : vector<8x256xf32>
    %cst_114 = arith.constant 1.275000e+01 : f32
    %236 = vector.broadcast %cst_114 : f32 to vector<8x256xf32>
    %237 = arith.cmpf olt, %15, %236 : vector<8x256xf32>
    %238 = arith.andi %235, %237 : vector<8x256xi1>
    %239 = vector.broadcast %230 : vector<8x1xf32> to vector<8x256xf32>
    %240 = arith.mulf %239, %15 : vector<8x256xf32>
    %241 = vector.broadcast %233 : vector<8x1xf32> to vector<8x256xf32>
    %242 = arith.addf %240, %241 : vector<8x256xf32>
    %243 = arith.select %238, %242, %15 : vector<8x256xi1>, vector<8x256xf32>
    %244 = arith.subf %47, %37 : vector<8x1xf32>
    %cst_115 = arith.constant 0.0784313753 : f32
    %245 = vector.broadcast %cst_115 : f32 to vector<8x1xf32>
    %246 = arith.mulf %244, %245 : vector<8x1xf32>
    %cst_116 = arith.constant 1.275000e+01 : f32
    %247 = vector.broadcast %cst_116 : f32 to vector<8x1xf32>
    %248 = arith.mulf %246, %247 : vector<8x1xf32>
    %249 = arith.subf %37, %248 : vector<8x1xf32>
    %cst_117 = arith.constant 1.275000e+01 : f32
    %250 = vector.broadcast %cst_117 : f32 to vector<8x256xf32>
    %251 = arith.cmpf ogt, %15, %250 : vector<8x256xf32>
    %cst_118 = arith.constant 2.550000e+01 : f32
    %252 = vector.broadcast %cst_118 : f32 to vector<8x256xf32>
    %253 = arith.cmpf olt, %15, %252 : vector<8x256xf32>
    %254 = arith.andi %251, %253 : vector<8x256xi1>
    %255 = vector.broadcast %246 : vector<8x1xf32> to vector<8x256xf32>
    %256 = arith.mulf %255, %15 : vector<8x256xf32>
    %257 = vector.broadcast %249 : vector<8x1xf32> to vector<8x256xf32>
    %258 = arith.addf %256, %257 : vector<8x256xf32>
    %259 = arith.select %254, %258, %243 : vector<8x256xi1>, vector<8x256xf32>
    %260 = arith.subf %57, %47 : vector<8x1xf32>
    %cst_119 = arith.constant 0.0784313753 : f32
    %261 = vector.broadcast %cst_119 : f32 to vector<8x1xf32>
    %262 = arith.mulf %260, %261 : vector<8x1xf32>
    %cst_120 = arith.constant 2.550000e+01 : f32
    %263 = vector.broadcast %cst_120 : f32 to vector<8x1xf32>
    %264 = arith.mulf %262, %263 : vector<8x1xf32>
    %265 = arith.subf %47, %264 : vector<8x1xf32>
    %cst_121 = arith.constant 2.550000e+01 : f32
    %266 = vector.broadcast %cst_121 : f32 to vector<8x256xf32>
    %267 = arith.cmpf ogt, %15, %266 : vector<8x256xf32>
    %cst_122 = arith.constant 3.825000e+01 : f32
    %268 = vector.broadcast %cst_122 : f32 to vector<8x256xf32>
    %269 = arith.cmpf olt, %15, %268 : vector<8x256xf32>
    %270 = arith.andi %267, %269 : vector<8x256xi1>
    %271 = vector.broadcast %262 : vector<8x1xf32> to vector<8x256xf32>
    %272 = arith.mulf %271, %15 : vector<8x256xf32>
    %273 = vector.broadcast %265 : vector<8x1xf32> to vector<8x256xf32>
    %274 = arith.addf %272, %273 : vector<8x256xf32>
    %275 = arith.select %270, %274, %259 : vector<8x256xi1>, vector<8x256xf32>
    %276 = arith.subf %67, %57 : vector<8x1xf32>
    %cst_123 = arith.constant 0.0784313753 : f32
    %277 = vector.broadcast %cst_123 : f32 to vector<8x1xf32>
    %278 = arith.mulf %276, %277 : vector<8x1xf32>
    %cst_124 = arith.constant 3.825000e+01 : f32
    %279 = vector.broadcast %cst_124 : f32 to vector<8x1xf32>
    %280 = arith.mulf %278, %279 : vector<8x1xf32>
    %281 = arith.subf %57, %280 : vector<8x1xf32>
    %cst_125 = arith.constant 3.825000e+01 : f32
    %282 = vector.broadcast %cst_125 : f32 to vector<8x256xf32>
    %283 = arith.cmpf ogt, %15, %282 : vector<8x256xf32>
    %cst_126 = arith.constant 5.100000e+01 : f32
    %284 = vector.broadcast %cst_126 : f32 to vector<8x256xf32>
    %285 = arith.cmpf olt, %15, %284 : vector<8x256xf32>
    %286 = arith.andi %283, %285 : vector<8x256xi1>
    %287 = vector.broadcast %278 : vector<8x1xf32> to vector<8x256xf32>
    %288 = arith.mulf %287, %15 : vector<8x256xf32>
    %289 = vector.broadcast %281 : vector<8x1xf32> to vector<8x256xf32>
    %290 = arith.addf %288, %289 : vector<8x256xf32>
    %291 = arith.select %286, %290, %275 : vector<8x256xi1>, vector<8x256xf32>
    %292 = arith.subf %77, %67 : vector<8x1xf32>
    %cst_127 = arith.constant 0.0784313753 : f32
    %293 = vector.broadcast %cst_127 : f32 to vector<8x1xf32>
    %294 = arith.mulf %292, %293 : vector<8x1xf32>
    %cst_128 = arith.constant 5.100000e+01 : f32
    %295 = vector.broadcast %cst_128 : f32 to vector<8x1xf32>
    %296 = arith.mulf %294, %295 : vector<8x1xf32>
    %297 = arith.subf %67, %296 : vector<8x1xf32>
    %cst_129 = arith.constant 5.100000e+01 : f32
    %298 = vector.broadcast %cst_129 : f32 to vector<8x256xf32>
    %299 = arith.cmpf ogt, %15, %298 : vector<8x256xf32>
    %cst_130 = arith.constant 6.375000e+01 : f32
    %300 = vector.broadcast %cst_130 : f32 to vector<8x256xf32>
    %301 = arith.cmpf olt, %15, %300 : vector<8x256xf32>
    %302 = arith.andi %299, %301 : vector<8x256xi1>
    %303 = vector.broadcast %294 : vector<8x1xf32> to vector<8x256xf32>
    %304 = arith.mulf %303, %15 : vector<8x256xf32>
    %305 = vector.broadcast %297 : vector<8x1xf32> to vector<8x256xf32>
    %306 = arith.addf %304, %305 : vector<8x256xf32>
    %307 = arith.select %302, %306, %291 : vector<8x256xi1>, vector<8x256xf32>
    %308 = arith.subf %87, %77 : vector<8x1xf32>
    %cst_131 = arith.constant 0.0784313753 : f32
    %309 = vector.broadcast %cst_131 : f32 to vector<8x1xf32>
    %310 = arith.mulf %308, %309 : vector<8x1xf32>
    %cst_132 = arith.constant 6.375000e+01 : f32
    %311 = vector.broadcast %cst_132 : f32 to vector<8x1xf32>
    %312 = arith.mulf %310, %311 : vector<8x1xf32>
    %313 = arith.subf %77, %312 : vector<8x1xf32>
    %cst_133 = arith.constant 6.375000e+01 : f32
    %314 = vector.broadcast %cst_133 : f32 to vector<8x256xf32>
    %315 = arith.cmpf ogt, %15, %314 : vector<8x256xf32>
    %cst_134 = arith.constant 7.650000e+01 : f32
    %316 = vector.broadcast %cst_134 : f32 to vector<8x256xf32>
    %317 = arith.cmpf olt, %15, %316 : vector<8x256xf32>
    %318 = arith.andi %315, %317 : vector<8x256xi1>
    %319 = vector.broadcast %310 : vector<8x1xf32> to vector<8x256xf32>
    %320 = arith.mulf %319, %15 : vector<8x256xf32>
    %321 = vector.broadcast %313 : vector<8x1xf32> to vector<8x256xf32>
    %322 = arith.addf %320, %321 : vector<8x256xf32>
    %323 = arith.select %318, %322, %307 : vector<8x256xi1>, vector<8x256xf32>
    %324 = arith.subf %97, %87 : vector<8x1xf32>
    %cst_135 = arith.constant 0.0784313753 : f32
    %325 = vector.broadcast %cst_135 : f32 to vector<8x1xf32>
    %326 = arith.mulf %324, %325 : vector<8x1xf32>
    %cst_136 = arith.constant 7.650000e+01 : f32
    %327 = vector.broadcast %cst_136 : f32 to vector<8x1xf32>
    %328 = arith.mulf %326, %327 : vector<8x1xf32>
    %329 = arith.subf %87, %328 : vector<8x1xf32>
    %cst_137 = arith.constant 7.650000e+01 : f32
    %330 = vector.broadcast %cst_137 : f32 to vector<8x256xf32>
    %331 = arith.cmpf ogt, %15, %330 : vector<8x256xf32>
    %cst_138 = arith.constant 8.925000e+01 : f32
    %332 = vector.broadcast %cst_138 : f32 to vector<8x256xf32>
    %333 = arith.cmpf olt, %15, %332 : vector<8x256xf32>
    %334 = arith.andi %331, %333 : vector<8x256xi1>
    %335 = vector.broadcast %326 : vector<8x1xf32> to vector<8x256xf32>
    %336 = arith.mulf %335, %15 : vector<8x256xf32>
    %337 = vector.broadcast %329 : vector<8x1xf32> to vector<8x256xf32>
    %338 = arith.addf %336, %337 : vector<8x256xf32>
    %339 = arith.select %334, %338, %323 : vector<8x256xi1>, vector<8x256xf32>
    %340 = arith.subf %107, %97 : vector<8x1xf32>
    %cst_139 = arith.constant 0.0784313753 : f32
    %341 = vector.broadcast %cst_139 : f32 to vector<8x1xf32>
    %342 = arith.mulf %340, %341 : vector<8x1xf32>
    %cst_140 = arith.constant 8.925000e+01 : f32
    %343 = vector.broadcast %cst_140 : f32 to vector<8x1xf32>
    %344 = arith.mulf %342, %343 : vector<8x1xf32>
    %345 = arith.subf %97, %344 : vector<8x1xf32>
    %cst_141 = arith.constant 8.925000e+01 : f32
    %346 = vector.broadcast %cst_141 : f32 to vector<8x256xf32>
    %347 = arith.cmpf ogt, %15, %346 : vector<8x256xf32>
    %cst_142 = arith.constant 1.020000e+02 : f32
    %348 = vector.broadcast %cst_142 : f32 to vector<8x256xf32>
    %349 = arith.cmpf olt, %15, %348 : vector<8x256xf32>
    %350 = arith.andi %347, %349 : vector<8x256xi1>
    %351 = vector.broadcast %342 : vector<8x1xf32> to vector<8x256xf32>
    %352 = arith.mulf %351, %15 : vector<8x256xf32>
    %353 = vector.broadcast %345 : vector<8x1xf32> to vector<8x256xf32>
    %354 = arith.addf %352, %353 : vector<8x256xf32>
    %355 = arith.select %350, %354, %339 : vector<8x256xi1>, vector<8x256xf32>
    %356 = arith.subf %117, %107 : vector<8x1xf32>
    %cst_143 = arith.constant 0.0784313753 : f32
    %357 = vector.broadcast %cst_143 : f32 to vector<8x1xf32>
    %358 = arith.mulf %356, %357 : vector<8x1xf32>
    %cst_144 = arith.constant 1.020000e+02 : f32
    %359 = vector.broadcast %cst_144 : f32 to vector<8x1xf32>
    %360 = arith.mulf %358, %359 : vector<8x1xf32>
    %361 = arith.subf %107, %360 : vector<8x1xf32>
    %cst_145 = arith.constant 1.020000e+02 : f32
    %362 = vector.broadcast %cst_145 : f32 to vector<8x256xf32>
    %363 = arith.cmpf ogt, %15, %362 : vector<8x256xf32>
    %cst_146 = arith.constant 1.147500e+02 : f32
    %364 = vector.broadcast %cst_146 : f32 to vector<8x256xf32>
    %365 = arith.cmpf olt, %15, %364 : vector<8x256xf32>
    %366 = arith.andi %363, %365 : vector<8x256xi1>
    %367 = vector.broadcast %358 : vector<8x1xf32> to vector<8x256xf32>
    %368 = arith.mulf %367, %15 : vector<8x256xf32>
    %369 = vector.broadcast %361 : vector<8x1xf32> to vector<8x256xf32>
    %370 = arith.addf %368, %369 : vector<8x256xf32>
    %371 = arith.select %366, %370, %355 : vector<8x256xi1>, vector<8x256xf32>
    %372 = arith.subf %127, %117 : vector<8x1xf32>
    %cst_147 = arith.constant 0.0784313753 : f32
    %373 = vector.broadcast %cst_147 : f32 to vector<8x1xf32>
    %374 = arith.mulf %372, %373 : vector<8x1xf32>
    %cst_148 = arith.constant 1.147500e+02 : f32
    %375 = vector.broadcast %cst_148 : f32 to vector<8x1xf32>
    %376 = arith.mulf %374, %375 : vector<8x1xf32>
    %377 = arith.subf %117, %376 : vector<8x1xf32>
    %cst_149 = arith.constant 1.147500e+02 : f32
    %378 = vector.broadcast %cst_149 : f32 to vector<8x256xf32>
    %379 = arith.cmpf ogt, %15, %378 : vector<8x256xf32>
    %cst_150 = arith.constant 1.275000e+02 : f32
    %380 = vector.broadcast %cst_150 : f32 to vector<8x256xf32>
    %381 = arith.cmpf olt, %15, %380 : vector<8x256xf32>
    %382 = arith.andi %379, %381 : vector<8x256xi1>
    %383 = vector.broadcast %374 : vector<8x1xf32> to vector<8x256xf32>
    %384 = arith.mulf %383, %15 : vector<8x256xf32>
    %385 = vector.broadcast %377 : vector<8x1xf32> to vector<8x256xf32>
    %386 = arith.addf %384, %385 : vector<8x256xf32>
    %387 = arith.select %382, %386, %371 : vector<8x256xi1>, vector<8x256xf32>
    %388 = arith.subf %137, %127 : vector<8x1xf32>
    %cst_151 = arith.constant 0.0784313753 : f32
    %389 = vector.broadcast %cst_151 : f32 to vector<8x1xf32>
    %390 = arith.mulf %388, %389 : vector<8x1xf32>
    %cst_152 = arith.constant 1.275000e+02 : f32
    %391 = vector.broadcast %cst_152 : f32 to vector<8x1xf32>
    %392 = arith.mulf %390, %391 : vector<8x1xf32>
    %393 = arith.subf %127, %392 : vector<8x1xf32>
    %cst_153 = arith.constant 1.275000e+02 : f32
    %394 = vector.broadcast %cst_153 : f32 to vector<8x256xf32>
    %395 = arith.cmpf ogt, %15, %394 : vector<8x256xf32>
    %cst_154 = arith.constant 1.402500e+02 : f32
    %396 = vector.broadcast %cst_154 : f32 to vector<8x256xf32>
    %397 = arith.cmpf olt, %15, %396 : vector<8x256xf32>
    %398 = arith.andi %395, %397 : vector<8x256xi1>
    %399 = vector.broadcast %390 : vector<8x1xf32> to vector<8x256xf32>
    %400 = arith.mulf %399, %15 : vector<8x256xf32>
    %401 = vector.broadcast %393 : vector<8x1xf32> to vector<8x256xf32>
    %402 = arith.addf %400, %401 : vector<8x256xf32>
    %403 = arith.select %398, %402, %387 : vector<8x256xi1>, vector<8x256xf32>
    %404 = arith.subf %147, %137 : vector<8x1xf32>
    %cst_155 = arith.constant 0.0784313753 : f32
    %405 = vector.broadcast %cst_155 : f32 to vector<8x1xf32>
    %406 = arith.mulf %404, %405 : vector<8x1xf32>
    %cst_156 = arith.constant 1.402500e+02 : f32
    %407 = vector.broadcast %cst_156 : f32 to vector<8x1xf32>
    %408 = arith.mulf %406, %407 : vector<8x1xf32>
    %409 = arith.subf %137, %408 : vector<8x1xf32>
    %cst_157 = arith.constant 1.402500e+02 : f32
    %410 = vector.broadcast %cst_157 : f32 to vector<8x256xf32>
    %411 = arith.cmpf ogt, %15, %410 : vector<8x256xf32>
    %cst_158 = arith.constant 1.530000e+02 : f32
    %412 = vector.broadcast %cst_158 : f32 to vector<8x256xf32>
    %413 = arith.cmpf olt, %15, %412 : vector<8x256xf32>
    %414 = arith.andi %411, %413 : vector<8x256xi1>
    %415 = vector.broadcast %406 : vector<8x1xf32> to vector<8x256xf32>
    %416 = arith.mulf %415, %15 : vector<8x256xf32>
    %417 = vector.broadcast %409 : vector<8x1xf32> to vector<8x256xf32>
    %418 = arith.addf %416, %417 : vector<8x256xf32>
    %419 = arith.select %414, %418, %403 : vector<8x256xi1>, vector<8x256xf32>
    %420 = arith.subf %157, %147 : vector<8x1xf32>
    %cst_159 = arith.constant 0.0784313753 : f32
    %421 = vector.broadcast %cst_159 : f32 to vector<8x1xf32>
    %422 = arith.mulf %420, %421 : vector<8x1xf32>
    %cst_160 = arith.constant 1.530000e+02 : f32
    %423 = vector.broadcast %cst_160 : f32 to vector<8x1xf32>
    %424 = arith.mulf %422, %423 : vector<8x1xf32>
    %425 = arith.subf %147, %424 : vector<8x1xf32>
    %cst_161 = arith.constant 1.530000e+02 : f32
    %426 = vector.broadcast %cst_161 : f32 to vector<8x256xf32>
    %427 = arith.cmpf ogt, %15, %426 : vector<8x256xf32>
    %cst_162 = arith.constant 1.657500e+02 : f32
    %428 = vector.broadcast %cst_162 : f32 to vector<8x256xf32>
    %429 = arith.cmpf olt, %15, %428 : vector<8x256xf32>
    %430 = arith.andi %427, %429 : vector<8x256xi1>
    %431 = vector.broadcast %422 : vector<8x1xf32> to vector<8x256xf32>
    %432 = arith.mulf %431, %15 : vector<8x256xf32>
    %433 = vector.broadcast %425 : vector<8x1xf32> to vector<8x256xf32>
    %434 = arith.addf %432, %433 : vector<8x256xf32>
    %435 = arith.select %430, %434, %419 : vector<8x256xi1>, vector<8x256xf32>
    %436 = arith.subf %167, %157 : vector<8x1xf32>
    %cst_163 = arith.constant 0.0784313753 : f32
    %437 = vector.broadcast %cst_163 : f32 to vector<8x1xf32>
    %438 = arith.mulf %436, %437 : vector<8x1xf32>
    %cst_164 = arith.constant 1.657500e+02 : f32
    %439 = vector.broadcast %cst_164 : f32 to vector<8x1xf32>
    %440 = arith.mulf %438, %439 : vector<8x1xf32>
    %441 = arith.subf %157, %440 : vector<8x1xf32>
    %cst_165 = arith.constant 1.657500e+02 : f32
    %442 = vector.broadcast %cst_165 : f32 to vector<8x256xf32>
    %443 = arith.cmpf ogt, %15, %442 : vector<8x256xf32>
    %cst_166 = arith.constant 1.785000e+02 : f32
    %444 = vector.broadcast %cst_166 : f32 to vector<8x256xf32>
    %445 = arith.cmpf olt, %15, %444 : vector<8x256xf32>
    %446 = arith.andi %443, %445 : vector<8x256xi1>
    %447 = vector.broadcast %438 : vector<8x1xf32> to vector<8x256xf32>
    %448 = arith.mulf %447, %15 : vector<8x256xf32>
    %449 = vector.broadcast %441 : vector<8x1xf32> to vector<8x256xf32>
    %450 = arith.addf %448, %449 : vector<8x256xf32>
    %451 = arith.select %446, %450, %435 : vector<8x256xi1>, vector<8x256xf32>
    %452 = arith.subf %177, %167 : vector<8x1xf32>
    %cst_167 = arith.constant 0.0784313753 : f32
    %453 = vector.broadcast %cst_167 : f32 to vector<8x1xf32>
    %454 = arith.mulf %452, %453 : vector<8x1xf32>
    %cst_168 = arith.constant 1.785000e+02 : f32
    %455 = vector.broadcast %cst_168 : f32 to vector<8x1xf32>
    %456 = arith.mulf %454, %455 : vector<8x1xf32>
    %457 = arith.subf %167, %456 : vector<8x1xf32>
    %cst_169 = arith.constant 1.785000e+02 : f32
    %458 = vector.broadcast %cst_169 : f32 to vector<8x256xf32>
    %459 = arith.cmpf ogt, %15, %458 : vector<8x256xf32>
    %cst_170 = arith.constant 1.912500e+02 : f32
    %460 = vector.broadcast %cst_170 : f32 to vector<8x256xf32>
    %461 = arith.cmpf olt, %15, %460 : vector<8x256xf32>
    %462 = arith.andi %459, %461 : vector<8x256xi1>
    %463 = vector.broadcast %454 : vector<8x1xf32> to vector<8x256xf32>
    %464 = arith.mulf %463, %15 : vector<8x256xf32>
    %465 = vector.broadcast %457 : vector<8x1xf32> to vector<8x256xf32>
    %466 = arith.addf %464, %465 : vector<8x256xf32>
    %467 = arith.select %462, %466, %451 : vector<8x256xi1>, vector<8x256xf32>
    %468 = arith.subf %187, %177 : vector<8x1xf32>
    %cst_171 = arith.constant 0.0784313753 : f32
    %469 = vector.broadcast %cst_171 : f32 to vector<8x1xf32>
    %470 = arith.mulf %468, %469 : vector<8x1xf32>
    %cst_172 = arith.constant 1.912500e+02 : f32
    %471 = vector.broadcast %cst_172 : f32 to vector<8x1xf32>
    %472 = arith.mulf %470, %471 : vector<8x1xf32>
    %473 = arith.subf %177, %472 : vector<8x1xf32>
    %cst_173 = arith.constant 1.912500e+02 : f32
    %474 = vector.broadcast %cst_173 : f32 to vector<8x256xf32>
    %475 = arith.cmpf ogt, %15, %474 : vector<8x256xf32>
    %cst_174 = arith.constant 2.040000e+02 : f32
    %476 = vector.broadcast %cst_174 : f32 to vector<8x256xf32>
    %477 = arith.cmpf olt, %15, %476 : vector<8x256xf32>
    %478 = arith.andi %475, %477 : vector<8x256xi1>
    %479 = vector.broadcast %470 : vector<8x1xf32> to vector<8x256xf32>
    %480 = arith.mulf %479, %15 : vector<8x256xf32>
    %481 = vector.broadcast %473 : vector<8x1xf32> to vector<8x256xf32>
    %482 = arith.addf %480, %481 : vector<8x256xf32>
    %483 = arith.select %478, %482, %467 : vector<8x256xi1>, vector<8x256xf32>
    %484 = arith.subf %197, %187 : vector<8x1xf32>
    %cst_175 = arith.constant 0.0784313753 : f32
    %485 = vector.broadcast %cst_175 : f32 to vector<8x1xf32>
    %486 = arith.mulf %484, %485 : vector<8x1xf32>
    %cst_176 = arith.constant 2.040000e+02 : f32
    %487 = vector.broadcast %cst_176 : f32 to vector<8x1xf32>
    %488 = arith.mulf %486, %487 : vector<8x1xf32>
    %489 = arith.subf %187, %488 : vector<8x1xf32>
    %cst_177 = arith.constant 2.040000e+02 : f32
    %490 = vector.broadcast %cst_177 : f32 to vector<8x256xf32>
    %491 = arith.cmpf ogt, %15, %490 : vector<8x256xf32>
    %cst_178 = arith.constant 2.167500e+02 : f32
    %492 = vector.broadcast %cst_178 : f32 to vector<8x256xf32>
    %493 = arith.cmpf olt, %15, %492 : vector<8x256xf32>
    %494 = arith.andi %491, %493 : vector<8x256xi1>
    %495 = vector.broadcast %486 : vector<8x1xf32> to vector<8x256xf32>
    %496 = arith.mulf %495, %15 : vector<8x256xf32>
    %497 = vector.broadcast %489 : vector<8x1xf32> to vector<8x256xf32>
    %498 = arith.addf %496, %497 : vector<8x256xf32>
    %499 = arith.select %494, %498, %483 : vector<8x256xi1>, vector<8x256xf32>
    %500 = arith.subf %207, %197 : vector<8x1xf32>
    %cst_179 = arith.constant 0.0784313753 : f32
    %501 = vector.broadcast %cst_179 : f32 to vector<8x1xf32>
    %502 = arith.mulf %500, %501 : vector<8x1xf32>
    %cst_180 = arith.constant 2.167500e+02 : f32
    %503 = vector.broadcast %cst_180 : f32 to vector<8x1xf32>
    %504 = arith.mulf %502, %503 : vector<8x1xf32>
    %505 = arith.subf %197, %504 : vector<8x1xf32>
    %cst_181 = arith.constant 2.167500e+02 : f32
    %506 = vector.broadcast %cst_181 : f32 to vector<8x256xf32>
    %507 = arith.cmpf ogt, %15, %506 : vector<8x256xf32>
    %cst_182 = arith.constant 2.295000e+02 : f32
    %508 = vector.broadcast %cst_182 : f32 to vector<8x256xf32>
    %509 = arith.cmpf olt, %15, %508 : vector<8x256xf32>
    %510 = arith.andi %507, %509 : vector<8x256xi1>
    %511 = vector.broadcast %502 : vector<8x1xf32> to vector<8x256xf32>
    %512 = arith.mulf %511, %15 : vector<8x256xf32>
    %513 = vector.broadcast %505 : vector<8x1xf32> to vector<8x256xf32>
    %514 = arith.addf %512, %513 : vector<8x256xf32>
    %515 = arith.select %510, %514, %499 : vector<8x256xi1>, vector<8x256xf32>
    %516 = arith.subf %217, %207 : vector<8x1xf32>
    %cst_183 = arith.constant 0.0784313753 : f32
    %517 = vector.broadcast %cst_183 : f32 to vector<8x1xf32>
    %518 = arith.mulf %516, %517 : vector<8x1xf32>
    %cst_184 = arith.constant 2.295000e+02 : f32
    %519 = vector.broadcast %cst_184 : f32 to vector<8x1xf32>
    %520 = arith.mulf %518, %519 : vector<8x1xf32>
    %521 = arith.subf %207, %520 : vector<8x1xf32>
    %cst_185 = arith.constant 2.295000e+02 : f32
    %522 = vector.broadcast %cst_185 : f32 to vector<8x256xf32>
    %523 = arith.cmpf ogt, %15, %522 : vector<8x256xf32>
    %cst_186 = arith.constant 2.422500e+02 : f32
    %524 = vector.broadcast %cst_186 : f32 to vector<8x256xf32>
    %525 = arith.cmpf olt, %15, %524 : vector<8x256xf32>
    %526 = arith.andi %523, %525 : vector<8x256xi1>
    %527 = vector.broadcast %518 : vector<8x1xf32> to vector<8x256xf32>
    %528 = arith.mulf %527, %15 : vector<8x256xf32>
    %529 = vector.broadcast %521 : vector<8x1xf32> to vector<8x256xf32>
    %530 = arith.addf %528, %529 : vector<8x256xf32>
    %531 = arith.select %526, %530, %515 : vector<8x256xi1>, vector<8x256xf32>
    %532 = arith.subf %227, %217 : vector<8x1xf32>
    %cst_187 = arith.constant 0.0784313753 : f32
    %533 = vector.broadcast %cst_187 : f32 to vector<8x1xf32>
    %534 = arith.mulf %532, %533 : vector<8x1xf32>
    %cst_188 = arith.constant 2.422500e+02 : f32
    %535 = vector.broadcast %cst_188 : f32 to vector<8x1xf32>
    %536 = arith.mulf %534, %535 : vector<8x1xf32>
    %537 = arith.subf %217, %536 : vector<8x1xf32>
    %cst_189 = arith.constant 2.422500e+02 : f32
    %538 = vector.broadcast %cst_189 : f32 to vector<8x256xf32>
    %539 = arith.cmpf ogt, %15, %538 : vector<8x256xf32>
    %cst_190 = arith.constant 2.550000e+02 : f32
    %540 = vector.broadcast %cst_190 : f32 to vector<8x256xf32>
    %541 = arith.cmpf olt, %15, %540 : vector<8x256xf32>
    %542 = arith.andi %539, %541 : vector<8x256xi1>
    %543 = vector.broadcast %534 : vector<8x1xf32> to vector<8x256xf32>
    %544 = arith.mulf %543, %15 : vector<8x256xf32>
    %545 = vector.broadcast %537 : vector<8x1xf32> to vector<8x256xf32>
    %546 = arith.addf %544, %545 : vector<8x256xf32>
    %547 = arith.select %542, %546, %531 : vector<8x256xi1>, vector<8x256xf32>
    %cst_191 = arith.constant dense<0x7F800000> : vector<8xf32>
    %548 = vector.multi_reduction <minimumf>, %547, %cst_191 [1] : vector<8x256xf32> to vector<8xf32>
    %549 = vector.shape_cast %548 : vector<8xf32> to vector<8x1xf32>
    %cst_192 = arith.constant dense<0xFF800000> : vector<8xf32>
    %550 = vector.multi_reduction <maximumf>, %547, %cst_192 [1] : vector<8x256xf32> to vector<8xf32>
    %551 = vector.shape_cast %550 : vector<8xf32> to vector<8x1xf32>
    %552 = vector.broadcast %549 : vector<8x1xf32> to vector<8x256xf32>
    %553 = arith.subf %547, %552 : vector<8x256xf32>
    %554 = arith.subf %551, %549 : vector<8x1xf32>
    %cst_193 = arith.constant 9.99999974E-6 : f32
    %555 = vector.broadcast %cst_193 : f32 to vector<8x1xf32>
    %556 = arith.addf %554, %555 : vector<8x1xf32>
    %cst_194 = arith.constant 2.550000e+02 : f32
    %557 = vector.broadcast %cst_194 : f32 to vector<8x1xf32>
    %558 = arith.divf %557, %556 : vector<8x1xf32>
    %559 = vector.broadcast %558 : vector<8x1xf32> to vector<8x256xf32>
    %560 = arith.mulf %553, %559 : vector<8x256xf32>
    %c0_195 = arith.constant 0 : index
    %c0_196 = arith.constant 0 : index
    %561 = vector.load %arg2[%c0_195, %c0_196] : memref<8x256xf32, #tpu.memory_space<vmem>>, vector<8x256xf32>
    tpu.vector_store %arg2[%c0_195, %c0_196], %560 {strides = array<i32>} : memref<8x256xf32, #tpu.memory_space<vmem>>, vector<8x256xf32>,
    return
  }
  func.func @transform_0(%arg0: i32) -> (i32, i32) {
    %c0_i32 = arith.constant 0 : i32
    %c0_i32_0 = arith.constant 0 : i32
    return %arg0, %c0_i32 : i32, i32
  }
  func.func @transform_1(%arg0: i32) -> (i32, i32) {
    %c0_i32 = arith.constant 0 : i32
    %c0_i32_0 = arith.constant 0 : i32
    return %arg0, %c0_i32 : i32, i32
  }
}

</mosaic_0001>

<bundles_post_ra>
// kernel: equalize.1
= control target key start
LH: loop header
LB: loop body
LE: loop exit
PB: predicated region body
PF: predicated region fallthrough
CT: control target
= control target key end

     0   :  { %s1107_s0 = inlined_call_operand.vmem [shape: f32[8,256], index: 0, kind: input, shape index: {}]   ;;  %s1108_s1 = inlined_call_operand.vmem [shape: f32[8,256], index: 1, kind: output, shape index: {}]  }
   0x1   :  { %v8_v0 = vld [vmem:[%s1107_s0] sm:$0xff]  ;;  %v9_v1 = vld [vmem:[%s1107_s0 + $0x8] sm:$0xff] }
   0x2   :  { %v10_v2 = vmin.f32 %v8_v0, %v9_v1  ;;  %v13_v3 = vmax.f32 %v8_v0, %v9_v1 }
   0x4   :  { %11 = vmin.xlane.f32.xlu0 %v10_v2 }
   0x8   :  { %14 = vmax.xlane.f32.xlu0 %v13_v3 }
  0x91   :  { %v12_v4 = vpop.xlane.xlu0 %11 }
  0x92   :  { %v20_v9 = vsub.f32 %v8_v0, %v12_v4  ;;  %v21_v10 = vsub.f32 %v9_v1, %v12_v4 }
  0x95   :  { %v15_v5 = vpop.xlane.xlu0 %14 }
  0x96   :  { %v16_v6 = vsub.f32 %v15_v5, %v12_v4 }
  0x98   :  { %v17_v7 = vadd.f32 1e-05, %v16_v6 }
  0x9a   :  { %578 = vrcp.f32 %v17_v7 }
  0xa4   :  { %v579_v8 = vpop.eup %578 }
  0xa5   :  { %v19_v11 = vmul.f32 255.0, %v579_v8 }
  0xa7   :  { %v22_v12 = vmul.f32 %v20_v9, %v19_v11  ;;  %v23_v13 = vmul.f32 %v21_v10, %v19_v11 }
  0xa9   :  { %v598_v14 = vmin.f32 %v22_v12, 254.99998  ;;  %v600_v15 = vmin.f32 %v23_v13, 254.99998 }
  0xab   :  { %v603_v16 = vmul.f32 0.1, %v598_v14  ;;  %v606_v17 = vmul.f32 0.1, %v600_v15  ;;  %vm242_vm0 = vcmp.gt.f32.partialorder %v598_v14, 0.0  ;;  %vm243_vm1 = vcmp.gt.f32.partialorder %v600_v15, 0.0 }
  0xac   :  { %vm244_vm2 = vcmp.lt.f32.partialorder %v598_v14, 12.75  ;;  %vm245_vm3 = vcmp.lt.f32.partialorder %v600_v15, 12.75  ;;  %vm258_vm4 = vcmp.gt.f32.partialorder %v598_v14, 12.75  ;;  %vm259_vm5 = vcmp.gt.f32.partialorder %v600_v15, 12.75 }
  0xad   :  { %v48_v18 = vsub.f32 3.05, %v603_v16  ;;  %v49_v19 = vsub.f32 3.05, %v606_v17  ;;  %v28_v20 = vsub.f32 0.5, %v603_v16  ;;  %v29_v21 = vsub.f32 0.5, %v606_v17  ;;  %vm685_vm13 = vmand %vm242_vm0, %vm244_vm2 }
  0xae   :  { %v68_v22 = vsub.f32 5.6, %v603_v16  ;;  %v69_v23 = vsub.f32 5.6, %v606_v17  ;;  %v38_v24 = vsub.f32 1.775, %v603_v16  ;;  %vm695_vm14 = vmand %vm243_vm1, %vm245_vm3 }
  0xaf   :  { %v50_v25 = vmax.f32 %v48_v18, 0.0  ;;  %v51_v26 = vmax.f32 %v49_v19, 0.0  ;;  %v30_v27 = vmax.f32 %v28_v20, 0.0  ;;  %v31_v28 = vmax.f32 %v29_v21, 0.0 }
  0xb0   :  { %v70_v29 = vmax.f32 %v68_v22, 0.0  ;;  %v71_v30 = vmax.f32 %v69_v23, 0.0  ;;  %v39_v31 = vsub.f32 1.775, %v606_v17  ;;  %v40_v32 = vmax.f32 %v38_v24, 0.0 }
  0xb1   :  { %v52_v33 = vmin.f32 %v50_v25, 1.0  ;;  %v53_v34 = vmin.f32 %v51_v26, 1.0  ;;  %v32_v35 = vmin.f32 %v30_v27, 1.0  ;;  %v33_v36 = vmin.f32 %v31_v28, 1.0 }
  0xb2   :  { %v72_v37 = vmin.f32 %v70_v29, 1.0  ;;  %v73_v38 = vmin.f32 %v71_v30, 1.0  ;;  %v41_v39 = vmax.f32 %v39_v31, 0.0  ;;  %v42_v40 = vmin.f32 %v40_v32, 1.0 }
  0xb3   :  { %v54_v41 = vadd.f32 %v53_v34, %v52_v33  ;;  %v34_v42 = vadd.f32 %v33_v36, %v32_v35  ;;  %v88_v43 = vsub.f32 8.15, %v603_v16  ;;  %v89_v44 = vsub.f32 8.15, %v606_v17 }
  0xb4   :  { %v74_v45 = vadd.f32 %v73_v38, %v72_v37  ;;  %v43_v46 = vmin.f32 %v41_v39, 1.0  ;;  %v58_v47 = vsub.f32 4.325, %v603_v16  ;;  %v59_v48 = vsub.f32 4.325, %v606_v17 }
  0xb5   :  { %55 = vadd.xlane.f32.xlu0 %v54_v41  ;;  %35 = vadd.xlane.f32.xlu1 %v34_v42  ;;  %v90_v49 = vmax.f32 %v88_v43, 0.0  ;;  %v91_v50 = vmax.f32 %v89_v44, 0.0  ;;  %v108_v51 = vsub.f32 10.7, %v603_v16  ;;  %v109_v52 = vsub.f32 10.7, %v606_v17 }
  0xb6   :  { %v44_v53 = vadd.f32 %v43_v46, %v42_v40  ;;  %v60_v54 = vmax.f32 %v58_v47, 0.0  ;;  %v61_v55 = vmax.f32 %v59_v48, 0.0  ;;  %v78_v56 = vsub.f32 6.875, %v603_v16 }
  0xb7   :  { %v92_v57 = vmin.f32 %v90_v49, 1.0  ;;  %v93_v58 = vmin.f32 %v91_v50, 1.0  ;;  %v110_v59 = vmax.f32 %v108_v51, 0.0  ;;  %v111_v60 = vmax.f32 %v109_v52, 0.0 }
  0xb8   :  { %v62_v61 = vmin.f32 %v60_v54, 1.0  ;;  %v63_v62 = vmin.f32 %v61_v55, 1.0  ;;  %v79_v63 = vsub.f32 6.875, %v606_v17  ;;  %v80_v0 = vmax.f32 %v78_v56, 0.0 }
  0xb9   :  { %75 = vadd.xlane.f32.xlu0 %v74_v45  ;;  %45 = vadd.xlane.f32.xlu1 %v44_v53  ;;  %v94_v1 = vadd.f32 %v93_v58, %v92_v57  ;;  %v112_v2 = vmin.f32 %v110_v59, 1.0  ;;  %v113_v3 = vmin.f32 %v111_v60, 1.0  ;;  %v128_v4 = vsub.f32 13.25, %v603_v16 }
  0xba   :  { %v64_v5 = vadd.f32 %v63_v62, %v62_v61  ;;  %v81_v6 = vmax.f32 %v79_v63, 0.0  ;;  %v82_v7 = vmin.f32 %v80_v0, 1.0  ;;  %v129_v8 = vsub.f32 13.25, %v606_v17 }
  0xbb   :  { %v114_v9 = vadd.f32 %v113_v3, %v112_v2  ;;  %v130_v10 = vmax.f32 %v128_v4, 0.0  ;;  %v98_v11 = vsub.f32 9.425, %v603_v16  ;;  %v99_v12 = vsub.f32 9.425, %v606_v17 }
  0xbc   :  { %v83_v13 = vmin.f32 %v81_v6, 1.0  ;;  %v131_v18 = vmax.f32 %v129_v8, 0.0  ;;  %v148_v19 = vsub.f32 15.8, %v603_v16  ;;  %v149_v20 = vsub.f32 15.8, %v606_v17 }
  0xbd   :  { %95 = vadd.xlane.f32.xlu0 %v94_v1  ;;  %65 = vadd.xlane.f32.xlu1 %v64_v5  ;;  %v132_v21 = vmin.f32 %v130_v10, 1.0  ;;  %v100_v22 = vmax.f32 %v98_v11, 0.0  ;;  %v101_v23 = vmax.f32 %v99_v12, 0.0  ;;  %v118_v24 = vsub.f32 11.975, %v603_v16 }
  0xbe   :  { %v84_v25 = vadd.f32 %v83_v13, %v82_v7  ;;  %v133_v26 = vmin.f32 %v131_v18, 1.0  ;;  %v150_v27 = vmax.f32 %v148_v19, 0.0  ;;  %v151_v28 = vmax.f32 %v149_v20, 0.0 }
  0xbf   :  { %v102_v29 = vmin.f32 %v100_v22, 1.0  ;;  %v103_v30 = vmin.f32 %v101_v23, 1.0  ;;  %v119_v31 = vsub.f32 11.975, %v606_v17  ;;  %v120_v32 = vmax.f32 %v118_v24, 0.0 }
  0xc0   :  { %v134_v33 = vadd.f32 %v133_v26, %v132_v21  ;;  %v152_v34 = vmin.f32 %v150_v27, 1.0  ;;  %v168_v35 = vsub.f32 18.35, %v603_v16  ;;  %v153_v37 = vmin.f32 %v151_v28, 1.0 }
  0xc1   :  { %115 = vadd.xlane.f32.xlu0 %v114_v9  ;;  %85 = vadd.xlane.f32.xlu1 %v84_v25  ;;  %v104_v36 = vadd.f32 %v103_v30, %v102_v29  ;;  %v121_v38 = vmax.f32 %v119_v31, 0.0  ;;  %v169_v39 = vsub.f32 18.35, %v606_v17  ;;  %v122_v40 = vmin.f32 %v120_v32, 1.0 }
  0xc2   :  { %v170_v41 = vmax.f32 %v168_v35, 0.0  ;;  %v138_v42 = vsub.f32 14.525001, %v603_v16  ;;  %v139_v43 = vsub.f32 14.525001, %v606_v17  ;;  %v154_v55 = vadd.f32 %v153_v37, %v152_v34 }
  0xc3   :  { %v123_v44 = vmin.f32 %v121_v38, 1.0  ;;  %v171_v45 = vmax.f32 %v169_v39, 0.0  ;;  %v188_v46 = vsub.f32 20.9, %v603_v16  ;;  %v189_v47 = vsub.f32 20.9, %v606_v17 }
  0xc4   :  { %v172_v48 = vmin.f32 %v170_v41, 1.0  ;;  %v140_v49 = vmax.f32 %v138_v42, 0.0  ;;  %v141_v50 = vmax.f32 %v139_v43, 0.0  ;;  %v158_v51 = vsub.f32 17.075, %v603_v16 }
  0xc5   :  { %135 = vadd.xlane.f32.xlu0 %v134_v33  ;;  %105 = vadd.xlane.f32.xlu1 %v104_v36  ;;  %v173_v52 = vmin.f32 %v171_v45, 1.0  ;;  %v190_v53 = vmax.f32 %v188_v46, 0.0  ;;  %v191_v54 = vmax.f32 %v189_v47, 0.0  ;;  %v124_v56 = vadd.f32 %v123_v44, %v122_v40 }
  0xc6   :  { %v159_v57 = vsub.f32 17.075, %v606_v17  ;;  %v160_v58 = vmax.f32 %v158_v51, 0.0  ;;  %v142_v60 = vmin.f32 %v140_v49, 1.0  ;;  %v143_v61 = vmin.f32 %v141_v50, 1.0 }
  0xc7   :  { %v174_v59 = vadd.f32 %v173_v52, %v172_v48  ;;  %v208_v62 = vsub.f32 23.45, %v603_v16  ;;  %v192_v63 = vmin.f32 %v190_v53, 1.0  ;;  %v193_v0 = vmin.f32 %v191_v54, 1.0 }
  0xc8   :  { %v161_v1 = vmax.f32 %v159_v57, 0.0  ;;  %v209_v2 = vsub.f32 23.45, %v606_v17  ;;  %v162_v3 = vmin.f32 %v160_v58, 1.0  ;;  %v178_v5 = vsub.f32 19.625, %v603_v16 }
  0xc9   :  { %155 = vadd.xlane.f32.xlu0 %v154_v55  ;;  %125 = vadd.xlane.f32.xlu1 %v124_v56  ;;  %v210_v4 = vmax.f32 %v208_v62, 0.0  ;;  %v179_v6 = vsub.f32 19.625, %v606_v17  ;;  %v228_v9 = vsub.f32 26.0, %v603_v16  ;;  %v229_v10 = vsub.f32 26.0, %v606_v17 }
  0xca   :  { %v163_v7 = vmin.f32 %v161_v1, 1.0  ;;  %v211_v8 = vmax.f32 %v209_v2, 0.0  ;;  %v144_v11 = vadd.f32 %v143_v61, %v142_v60  ;;  %v180_v12 = vmax.f32 %v178_v5, 0.0 }
  0xcb   :  { %v181_v13 = vmax.f32 %v179_v6, 0.0  ;;  %v198_v18 = vsub.f32 22.175001, %v603_v16  ;;  %v194_v19 = vadd.f32 %v193_v0, %v192_v63  ;;  %v212_v21 = vmin.f32 %v210_v4, 1.0 }
  0xcc   :  { %v164_v20 = vadd.f32 %v163_v7, %v162_v3  ;;  %v213_v22 = vmin.f32 %v211_v8, 1.0  ;;  %v199_v23 = vsub.f32 22.175001, %v606_v17  ;;  %v182_v24 = vmin.f32 %v180_v12, 1.0 }
  0xcd   :  { %175 = vadd.xlane.f32.xlu0 %v174_v59  ;;  %145 = vadd.xlane.f32.xlu1 %v144_v11  ;;  %v183_v25 = vmin.f32 %v181_v13, 1.0  ;;  %v230_v26 = vmax.f32 %v228_v9, 0.0  ;;  %v231_v27 = vmax.f32 %v229_v10, 0.0  ;;  %v200_v28 = vmax.f32 %v198_v18, 0.0 }
  0xce   :  { %v201_v29 = vmax.f32 %v199_v23, 0.0  ;;  %v218_v30 = vsub.f32 24.725, %v603_v16  ;;  %v219_v31 = vsub.f32 24.725, %v606_v17  ;;  %v214_v32 = vadd.f32 %v213_v22, %v212_v21 }
  0xcf   :  { %v184_v33 = vadd.f32 %v183_v25, %v182_v24  ;;  %v232_v34 = vmin.f32 %v230_v26, 1.0  ;;  %v233_v35 = vmin.f32 %v231_v27, 1.0  ;;  %v202_v36 = vmin.f32 %v200_v28, 1.0 }
  0xd0   :  { %v203_v37 = vmin.f32 %v201_v29, 1.0  ;;  %v220_v38 = vmax.f32 %v218_v30, 0.0  ;;  %v221_v39 = vmax.f32 %v219_v31, 0.0  ;;  %vm260_vm6 = vcmp.lt.f32.partialorder %v598_v14, 25.5 }
  0xd1   :  { %195 = vadd.xlane.f32.xlu0 %v194_v19  ;;  %165 = vadd.xlane.f32.xlu1 %v164_v20  ;;  %v234_v40 = vadd.f32 %v233_v35, %v232_v34  ;;  %vm261_vm7 = vcmp.lt.f32.partialorder %v600_v15, 25.5  ;;  %vm274_vm8 = vcmp.gt.f32.partialorder %v598_v14, 25.5  ;;  %vm275_vm9 = vcmp.gt.f32.partialorder %v600_v15, 25.5  ;;  %vm262_vm1 = vmand %vm258_vm4, %vm260_vm6 }
  0xd2   :  { %v204_v41 = vadd.f32 %v203_v37, %v202_v36  ;;  %v222_v42 = vmin.f32 %v220_v38, 1.0  ;;  %v223_v43 = vmin.f32 %v221_v39, 1.0  ;;  %vm276_vm10 = vcmp.lt.f32.partialorder %v598_v14, 38.25  ;;  %vm263_vm4 = vmand %vm259_vm5, %vm261_vm7 }
  0xd3   :  { %vm277_vm11 = vcmp.lt.f32.partialorder %v600_v15, 38.25  ;;  %vm306_vm15 = vcmp.gt.f32.partialorder %v598_v14, 51.0  ;;  %vm308_vm12 = vcmp.lt.f32.partialorder %v598_v14, 63.75  ;;  %vm309_vm2 = vcmp.lt.f32.partialorder %v600_v15, 63.75 }
  0xd4   :  { %v224_v16 = vadd.f32 %v223_v43, %v222_v42  ;;  %vm322_vm3 = vcmp.gt.f32.partialorder %v598_v14, 63.75  ;;  %vm324_vm0 = vcmp.lt.f32.partialorder %v598_v14, 76.5  ;;  %vm744_vm5 = vmand %vm275_vm9, %vm277_vm11  ;;  %vm339_vm9 = vcmp.gt.f32.partialorder %v600_v15, 76.5 }
  0xd5   :  { %215 = vadd.xlane.f32.xlu0 %v214_v32  ;;  %185 = vadd.xlane.f32.xlu1 %v184_v33  ;;  %vm341_vm11 = vcmp.lt.f32.partialorder %v600_v15, 89.25  ;;  %vm1119_vm7 = vcmp.lt.f32.partialorder %v600_v15, 51.0 }
  0xd9   :  { %235 = vadd.xlane.f32.xlu0 %v234_v40  ;;  %205 = vadd.xlane.f32.xlu1 %v204_v41 }
  0xdd   :  { %225 = vadd.xlane.f32.xlu1 %v224_v16 }
 0x142   :  { %v56_v17 = vpop.xlane.xlu0 %55  ;;  %v36_v44 = vpop.xlane.xlu1 %35 }
 0x143   :  { %v650_v47 = vmul.f32 0.00390625, %v56_v17  ;;  %v37_v48 = vmul.f32 0.00390625, %v36_v44 }
 0x146   :  { %v76_v45 = vpop.xlane.xlu0 %75  ;;  %v46_v46 = vpop.xlane.xlu1 %45 }
 0x147   :  { %v47_v49 = vmul.f32 0.00390625, %v46_v46  ;;  %v663_v57 = vmul.f32 0.00390625, %v76_v45 }
 0x149   :  { %v238_v50 = vsub.f32 %v47_v49, %v37_v48  ;;  %v254_v51 = vsub.f32 %v650_v47, %v47_v49 }
 0x14a   :  { %v96_v52 = vpop.xlane.xlu0 %95  ;;  %v66_v53 = vpop.xlane.xlu1 %65 }
 0x14b   :  { %v239_v54 = vmul.f32 0.078431375, %v238_v50  ;;  %v255_v55 = vmul.f32 0.078431375, %v254_v51  ;;  %v67_v56 = vmul.f32 0.00390625, %v66_v53  ;;  %v677_v6 = vmul.f32 0.00390625, %v96_v52 }
 0x14d   :  { %v240_v58 = vmul.f32 0.0, %v239_v54  ;;  %v256_v59 = vmul.f32 12.75, %v255_v55  ;;  %v248_v60 = vmul.f32 %v239_v54, %v598_v14  ;;  %v249_v61 = vmul.f32 %v239_v54, %v600_v15 }
 0x14e   :  { %v270_v62 = vsub.f32 %v67_v56, %v650_v47  ;;  %v286_v63 = vsub.f32 %v663_v57, %v67_v56  ;;  %v116_v0 = vpop.xlane.xlu0 %115  ;;  %v86_v1 = vpop.xlane.xlu1 %85  ;;  %v264_v4 = vmul.f32 %v255_v55, %v598_v14  ;;  %v265_v5 = vmul.f32 %v255_v55, %v600_v15 }
 0x14f   :  { %v241_v2 = vsub.f32 %v37_v48, %v240_v58  ;;  %v257_v3 = vsub.f32 %v47_v49, %v256_v59  ;;  %v679_v9 = vmul.f32 0.00390625, %v86_v1  ;;  %v700_v23 = vmul.f32 0.00390625, %v116_v0 }
 0x150   :  { %v271_v7 = vmul.f32 0.078431375, %v270_v62  ;;  %v287_v8 = vmul.f32 0.078431375, %v286_v63 }
 0x151   :  { %v250_v11 = vadd.f32 %v248_v60, %v241_v2  ;;  %v251_v12 = vadd.f32 %v249_v61, %v241_v2  ;;  %v266_v13 = vadd.f32 %v264_v4, %v257_v3  ;;  %v267_v18 = vadd.f32 %v265_v5, %v257_v3 }
 0x152   :  { %v272_v20 = vmul.f32 25.5, %v271_v7  ;;  %v280_v21 = vmul.f32 %v271_v7, %v598_v14  ;;  %v288_v22 = vmul.f32 38.25, %v287_v8  ;;  %v136_v24 = vpop.xlane.xlu0 %135  ;;  %v106_v25 = vpop.xlane.xlu1 %105  ;;  %v281_v28 = vmul.f32 %v271_v7, %v600_v15 }
 0x153   :  { %v252_v26 = vsel %vm685_vm13, %v250_v11, %v598_v14  ;;  %v253_v27 = vsel %vm695_vm14, %v251_v12, %v600_v15  ;;  %v296_v29 = vmul.f32 %v287_v8, %v598_v14  ;;  %v297_v33 = vmul.f32 %v287_v8, %v600_v15  ;;  %vm730_vm14 = vmand %vm274_vm8, %vm276_vm10 }
 0x154   :  { %v268_v30 = vsel %vm262_vm1, %v266_v13, %v252_v26  ;;  %v273_v31 = vsub.f32 %v650_v47, %v272_v20  ;;  %v289_v32 = vsub.f32 %v67_v56, %v288_v22  ;;  %vm325_vm13 = vcmp.lt.f32.partialorder %v600_v15, 76.5 }
 0x155   :  { %v269_v34 = vsel %vm263_vm4, %v267_v18, %v253_v27  ;;  %v302_v36 = vsub.f32 %v679_v9, %v663_v57  ;;  %v318_v37 = vsub.f32 %v677_v6, %v679_v9  ;;  %v738_v38 = vmul.f32 0.00390625, %v106_v25 }
 0x156   :  { %v282_v40 = vadd.f32 %v280_v21, %v273_v31  ;;  %v283_v41 = vadd.f32 %v281_v28, %v273_v31  ;;  %v298_v42 = vadd.f32 %v296_v29, %v289_v32  ;;  %v299_v43 = vadd.f32 %v297_v33, %v289_v32  ;;  %v156_v16 = vpop.xlane.xlu0 %155  ;;  %v126_v17 = vpop.xlane.xlu1 %125 }
 0x157   :  { %vm1117_vm10 = vcmp.lt.f32.partialorder %v598_v14, 51.0  ;;  %vm1118_vm1 = vcmp.gt.f32.partialorder %v598_v14, 38.25  ;;  %v303_v44 = vmul.f32 0.078431375, %v302_v36  ;;  %v319_v45 = vmul.f32 0.078431375, %v318_v37 }
 0x158   :  { %vm294_vm4 = vmand %vm1118_vm1, %vm1117_vm10  ;;  %v334_v46 = vsub.f32 %v738_v38, %v677_v6  ;;  %v350_v47 = vsub.f32 %v700_v23, %v738_v38  ;;  %vm1120_vm8 = vcmp.gt.f32.partialorder %v600_v15, 38.25  ;;  %v284_v48 = vsel %vm730_vm14, %v282_v40, %v268_v30 }
 0x159   :  { %vm295_vm6 = vmand %vm1120_vm8, %vm1119_vm7  ;;  %v285_v49 = vsel %vm744_vm5, %v283_v41, %v269_v34  ;;  %v768_v50 = vmul.f32 0.00390625, %v136_v24  ;;  %v770_v51 = vmul.f32 0.00390625, %v126_v17  ;;  %v300_v52 = vsel %vm294_vm4, %v298_v42, %v284_v48 }
 0x15a   :  { %v301_v53 = vsel %vm295_vm6, %v299_v43, %v285_v49  ;;  %v304_v54 = vmul.f32 51.0, %v303_v44  ;;  %vm354_vm10 = vcmp.gt.f32.partialorder %v598_v14, 89.25  ;;  %vm356_vm1 = vcmp.lt.f32.partialorder %v598_v14, 102.0  ;;  %v146_v61 = vpop.xlane.xlu1 %145  ;;  %vm787_vm6 = vmand %vm306_vm15, %vm308_vm12  ;;  %v176_v25 = vpop.xlane.xlu0 %175 }
 0x15b   :  { %v774_v55 = vmul.f32 0.00390625, %v156_v16  ;;  %v312_v56 = vmul.f32 %v303_v44, %v598_v14  ;;  %v313_v58 = vmul.f32 %v303_v44, %v600_v15  ;;  %v320_v59 = vmul.f32 63.75, %v319_v45  ;;  %vm326_vm4 = vmand %vm322_vm3, %vm324_vm0 }
 0x15c   :  { %v328_v60 = vmul.f32 %v319_v45, %v598_v14  ;;  %vm357_vm5 = vcmp.lt.f32.partialorder %v600_v15, 102.0  ;;  %v305_v62 = vsub.f32 %v663_v57, %v304_v54  ;;  %v329_v63 = vmul.f32 %v319_v45, %v600_v15 }
 0x15d   :  { %v335_v0 = vmul.f32 0.078431375, %v334_v46  ;;  %v351_v1 = vmul.f32 0.078431375, %v350_v47  ;;  %v321_v3 = vsub.f32 %v679_v9, %v320_v59  ;;  %v366_v4 = vsub.f32 %v770_v51, %v700_v23 }
 0x15e   :  { %v382_v57 = vsub.f32 %v768_v50, %v770_v51  ;;  %v796_v5 = vmul.f32 0.00390625, %v146_v61  ;;  %vm1123_vm7 = vcmp.gt.f32.partialorder %v600_v15, 51.0  ;;  %v314_v8 = vadd.f32 %v312_v56, %v305_v62  ;;  %v166_v39 = vpop.xlane.xlu1 %165  ;;  %v196_v48 = vpop.xlane.xlu0 %195 }
 0x15f   :  { %vm802_vm8 = vmand %vm1123_vm7, %vm309_vm2  ;;  %v315_v10 = vadd.f32 %v313_v58, %v305_v62  ;;  %v336_v11 = vmul.f32 76.5, %v335_v0  ;;  %v344_v9 = vmul.f32 %v335_v0, %v598_v14  ;;  %vm372_vm15 = vcmp.lt.f32.partialorder %v598_v14, 114.75 }
 0x160   :  { %v330_v12 = vadd.f32 %v328_v60, %v321_v3  ;;  %v331_v13 = vadd.f32 %v329_v63, %v321_v3  ;;  %v345_v18 = vmul.f32 %v335_v0, %v600_v15  ;;  %v352_v19 = vmul.f32 89.25, %v351_v1 }
 0x161   :  { %vm371_vm2 = vcmp.gt.f32.partialorder %v600_v15, 102.0  ;;  %vm373_vm7 = vcmp.lt.f32.partialorder %v600_v15, 114.75  ;;  %vm1126_vm12 = vcmp.gt.f32.partialorder %v600_v15, 63.75  ;;  %v316_v20 = vsel %vm787_vm6, %v314_v8, %v300_v52 }
 0x162   :  { %vm327_vm14 = vmand %vm1126_vm12, %vm325_vm13  ;;  %v317_v21 = vsel %vm802_vm8, %v315_v10, %v301_v53  ;;  %v337_v22 = vsub.f32 %v677_v6, %v336_v11  ;;  %v360_v24 = vmul.f32 %v351_v1, %v598_v14  ;;  %v332_v26 = vsel %vm326_vm4, %v330_v12, %v316_v20  ;;  %v186_v0 = vpop.xlane.xlu1 %185 }
 0x163   :  { %v333_v27 = vsel %vm327_vm14, %v331_v13, %v317_v21  ;;  %v353_v28 = vsub.f32 %v738_v38, %v352_v19  ;;  %v361_v29 = vmul.f32 %v351_v1, %v600_v15  ;;  %vm386_vm0 = vcmp.gt.f32.partialorder %v598_v14, 114.75  ;;  %vm844_vm4 = vmand %vm339_vm9, %vm341_vm11  ;;  %v216_v21 = vpop.xlane.xlu0 %215 }
 0x164   :  { %vm388_vm3 = vcmp.lt.f32.partialorder %v598_v14, 127.5  ;;  %vm1127_vm13 = vcmp.lt.f32.partialorder %v598_v14, 89.25  ;;  %vm1128_vm6 = vcmp.gt.f32.partialorder %v598_v14, 76.5  ;;  %v346_v6 = vadd.f32 %v344_v9, %v337_v22 }
 0x165   :  { %vm834_vm8 = vmand %vm1128_vm6, %vm1127_vm13  ;;  %v347_v31 = vadd.f32 %v345_v18, %v337_v22  ;;  %v367_v32 = vmul.f32 0.078431375, %v366_v4  ;;  %v383_v33 = vmul.f32 0.078431375, %v382_v57  ;;  %vm402_vm14 = vcmp.gt.f32.partialorder %v598_v14, 127.5 }
 0x166   :  { %vm404_vm12 = vcmp.lt.f32.partialorder %v598_v14, 140.25  ;;  %v362_v35 = vadd.f32 %v360_v24, %v353_v28  ;;  %v363_v36 = vadd.f32 %v361_v29, %v353_v28  ;;  %v398_v37 = vsub.f32 %v796_v5, %v768_v50  ;;  %vm358_vm13 = vmand %vm354_vm10, %vm356_vm1 }
 0x167   :  { %v414_v38 = vsub.f32 %v774_v55, %v796_v5  ;;  %v348_v40 = vsel %vm834_vm8, %v346_v6, %v332_v26  ;;  %v349_v41 = vsel %vm844_vm4, %v347_v31, %v333_v27  ;;  %v368_v42 = vmul.f32 102.0, %v367_v32  ;;  %v206_v31 = vpop.xlane.xlu1 %205 }
 0x168   :  { %vm405_vm11 = vcmp.lt.f32.partialorder %v600_v15, 140.25  ;;  %v376_v43 = vmul.f32 %v367_v32, %v598_v14  ;;  %v384_v16 = vmul.f32 114.75, %v383_v33  ;;  %v865_v17 = vmul.f32 0.00390625, %v176_v25 }
 0x169   :  { %vm418_vm8 = vcmp.gt.f32.partialorder %v598_v14, 140.25  ;;  %vm420_vm6 = vcmp.lt.f32.partialorder %v598_v14, 153.0  ;;  %vm1133_vm4 = vcmp.gt.f32.partialorder %v600_v15, 89.25  ;;  %v364_v44 = vsel %vm358_vm13, %v362_v35, %v348_v40 }
 0x16a   :  { %vm359_vm9 = vmand %vm1133_vm4, %vm357_vm5  ;;  %v369_v45 = vsub.f32 %v700_v23, %v368_v42  ;;  %v377_v46 = vmul.f32 %v367_v32, %v600_v15  ;;  %v399_v47 = vmul.f32 0.078431375, %v398_v37  ;;  %v385_v52 = vsub.f32 %v770_v51, %v384_v16 }
 0x16b   :  { %v365_v49 = vsel %vm359_vm9, %v363_v36, %v349_v41  ;;  %v392_v53 = vmul.f32 %v383_v33, %v598_v14  ;;  %v415_v54 = vmul.f32 0.078431375, %v414_v38  ;;  %vm419_vm10 = vcmp.gt.f32.partialorder %v600_v15, 140.25  ;;  %vm894_vm9 = vmand %vm371_vm2, %vm373_vm7 }
 0x16c   :  { %v378_v56 = vadd.f32 %v376_v43, %v369_v45  ;;  %v379_v58 = vadd.f32 %v377_v46, %v369_v45  ;;  %vm421_vm1 = vcmp.lt.f32.partialorder %v600_v15, 153.0  ;;  %v400_v59 = vmul.f32 127.5, %v399_v47  ;;  %vm923_vm2 = vmand %vm402_vm14, %vm404_vm12 }
 0x16d   :  { %v167_v60 = vmul.f32 0.00390625, %v166_v39  ;;  %vm1134_vm5 = vcmp.gt.f32.partialorder %v598_v14, 102.0  ;;  %v393_v51 = vmul.f32 %v383_v33, %v600_v15  ;;  %v394_v61 = vadd.f32 %v392_v53, %v385_v52 }
 0x16e   :  { %vm883_vm13 = vmand %vm1134_vm5, %vm372_vm15  ;;  %v416_v62 = vmul.f32 140.25, %v415_v54  ;;  %v888_v63 = vmul.f32 0.00390625, %v196_v48  ;;  %v401_v3 = vsub.f32 %v768_v50, %v400_v59  ;;  %v408_v4 = vmul.f32 %v399_v47, %v598_v14 }
 0x16f   :  { %v380_v2 = vsel %vm883_vm13, %v378_v56, %v364_v44  ;;  %v409_v57 = vmul.f32 %v399_v47, %v600_v15  ;;  %vm434_vm15 = vcmp.gt.f32.partialorder %v598_v14, 153.0  ;;  %vm436_vm4 = vcmp.lt.f32.partialorder %v598_v14, 165.75  ;;  %vm390_vm5 = vmand %vm386_vm0, %vm388_vm3 }
 0x170   :  { %v381_v7 = vsel %vm894_vm9, %v379_v58, %v365_v49  ;;  %v395_v8 = vadd.f32 %v393_v51, %v385_v52  ;;  %v417_v10 = vsub.f32 %v796_v5, %v416_v62  ;;  %v424_v11 = vmul.f32 %v415_v54, %v598_v14  ;;  %v236_v51 = vpop.xlane.xlu0 %235  ;;  %v226_v62 = vpop.xlane.xlu1 %225 }
 0x171   :  { %vm437_vm7 = vcmp.lt.f32.partialorder %v600_v15, 165.75  ;;  %v410_v50 = vadd.f32 %v408_v4, %v401_v3  ;;  %v411_v9 = vadd.f32 %v409_v57, %v401_v3  ;;  %v430_v12 = vsub.f32 %v167_v60, %v774_v55 }
 0x172   :  { %v446_v5 = vsub.f32 %v865_v17, %v167_v60  ;;  %v396_v13 = vsel %vm390_vm5, %v394_v61, %v380_v2  ;;  %v425_v19 = vmul.f32 %v415_v54, %v600_v15  ;;  %v426_v20 = vadd.f32 %v424_v11, %v417_v10 }
 0x173   :  { %v187_v22 = vmul.f32 0.00390625, %v186_v0  ;;  %vm1141_vm13 = vcmp.lt.f32.partialorder %v600_v15, 127.5  ;;  %vm1142_vm5 = vcmp.gt.f32.partialorder %v600_v15, 114.75  ;;  %v412_v24 = vsel %vm923_vm2, %v410_v50, %v396_v13 }
 0x174   :  { %vm391_vm9 = vmand %vm1142_vm5, %vm1141_vm13  ;;  %v431_v25 = vmul.f32 0.078431375, %v430_v12  ;;  %v447_v26 = vmul.f32 0.078431375, %v446_v5  ;;  %vm466_vm14 = vcmp.gt.f32.partialorder %v598_v14, 178.5  ;;  %vm468_vm12 = vcmp.lt.f32.partialorder %v598_v14, 191.25 }
 0x175   :  { %v397_v27 = vsel %vm391_vm9, %v395_v8, %v381_v7  ;;  %vm1143_vm0 = vcmp.gt.f32.partialorder %v600_v15, 127.5  ;;  %v427_v29 = vadd.f32 %v425_v19, %v417_v10  ;;  %vm467_vm13 = vcmp.gt.f32.partialorder %v600_v15, 178.5  ;;  %vm422_vm9 = vmand %vm418_vm8, %vm420_vm6 }
 0x176   :  { %vm942_vm3 = vmand %vm1143_vm0, %vm405_vm11  ;;  %vm469_vm2 = vcmp.lt.f32.partialorder %v600_v15, 191.25  ;;  %v462_v30 = vsub.f32 %v187_v22, %v865_v17  ;;  %v478_v6 = vsub.f32 %v888_v63, %v187_v22  ;;  %v432_v33 = vmul.f32 153.0, %v431_v25 }
 0x177   :  { %v413_v32 = vsel %vm942_vm3, %v411_v9, %v397_v27  ;;  %v448_v34 = vmul.f32 165.75, %v447_v26  ;;  %v956_v35 = vmul.f32 0.00390625, %v216_v21  ;;  %v428_v36 = vsel %vm422_vm9, %v426_v20, %v412_v24  ;;  %vm423_vm8 = vmand %vm419_vm10, %vm421_vm1 }
 0x178   :  { %v440_v37 = vmul.f32 %v431_v25, %v598_v14  ;;  %v463_v38 = vmul.f32 0.078431375, %v462_v30  ;;  %v479_v39 = vmul.f32 0.078431375, %v478_v6  ;;  %v433_v40 = vsub.f32 %v774_v55, %v432_v33  ;;  %vm978_vm10 = vmand %vm434_vm15, %vm436_vm4 }
 0x179   :  { %v441_v41 = vmul.f32 %v431_v25, %v600_v15  ;;  %v449_v42 = vsub.f32 %v167_v60, %v448_v34  ;;  %vm482_vm11 = vcmp.gt.f32.partialorder %v598_v14, 191.25  ;;  %vm484_vm6 = vcmp.lt.f32.partialorder %v598_v14, 204.0 }
 0x17a   :  { %v207_v43 = vmul.f32 0.00390625, %v206_v31  ;;  %v456_v16 = vmul.f32 %v447_v26, %v598_v14  ;;  %v457_v44 = vmul.f32 %v447_v26, %v600_v15  ;;  %v464_v55 = vmul.f32 178.5, %v463_v38 }
 0x17b   :  { %v480_v45 = vmul.f32 191.25, %v479_v39  ;;  %v429_v46 = vsel %vm423_vm8, %v427_v29, %v413_v32  ;;  %v442_v47 = vadd.f32 %v440_v37, %v433_v40  ;;  %v443_v48 = vadd.f32 %v441_v41, %v433_v40 }
 0x17c   :  { %v472_v49 = vmul.f32 %v463_v38, %v598_v14  ;;  %v458_v53 = vadd.f32 %v456_v16, %v449_v42  ;;  %v459_v54 = vadd.f32 %v457_v44, %v449_v42  ;;  %v465_v56 = vsub.f32 %v865_v17, %v464_v55 }
 0x17d   :  { %v473_v58 = vmul.f32 %v463_v38, %v600_v15  ;;  %vm1148_vm5 = vcmp.gt.f32.partialorder %v600_v15, 153.0  ;;  %v444_v60 = vsel %vm978_vm10, %v442_v47, %v428_v36  ;;  %v481_v23 = vsub.f32 %v187_v22, %v480_v45 }
 0x17e   :  { %vm990_vm9 = vmand %vm1148_vm5, %vm437_vm7  ;;  %v494_v17 = vsub.f32 %v207_v43, %v888_v63  ;;  %v510_v61 = vsub.f32 %v956_v35, %v207_v43  ;;  %vm516_vm4 = vcmp.lt.f32.partialorder %v598_v14, 229.5  ;;  %vm1151_vm1 = vcmp.lt.f32.partialorder %v598_v14, 178.5 }
 0x17f   :  { %vm1152_vm7 = vcmp.gt.f32.partialorder %v598_v14, 165.75  ;;  %v445_v0 = vsel %vm990_vm9, %v443_v48, %v429_v46  ;;  %v474_v1 = vadd.f32 %v472_v49, %v465_v56  ;;  %v475_v2 = vadd.f32 %v473_v58, %v465_v56  ;;  %vm1019_vm9 = vmand %vm466_vm14, %vm468_vm12 }
 0x180   :  { %vm454_vm5 = vmand %vm1152_vm7, %vm1151_vm1  ;;  %vm515_vm10 = vcmp.gt.f32.partialorder %v600_v15, 216.75  ;;  %vm517_vm8 = vcmp.lt.f32.partialorder %v600_v15, 229.5  ;;  %vm1153_vm0 = vcmp.lt.f32.partialorder %v600_v15, 178.5  ;;  %vm1154_vm15 = vcmp.gt.f32.partialorder %v600_v15, 165.75 }
 0x181   :  { %vm455_vm3 = vmand %vm1154_vm15, %vm1153_vm0  ;;  %v488_v3 = vmul.f32 %v479_v39, %v598_v14  ;;  %v489_v4 = vmul.f32 %v479_v39, %v600_v15  ;;  %v495_v57 = vmul.f32 0.078431375, %v494_v17  ;;  %v511_v7 = vmul.f32 0.078431375, %v510_v61 }
 0x182   :  { %vm530_vm1 = vcmp.gt.f32.partialorder %v598_v14, 229.5  ;;  %v460_v8 = vsel %vm454_vm5, %v458_v53, %v444_v60  ;;  %v237_v11 = vmul.f32 0.00390625, %v236_v51  ;;  %v227_v50 = vmul.f32 0.00390625, %v226_v62  ;;  %vm1029_vm7 = vmand %vm467_vm13, %vm469_vm2 }
 0x183   :  { %vm531_vm0 = vcmp.gt.f32.partialorder %v600_v15, 229.5  ;;  %vm532_vm15 = vcmp.lt.f32.partialorder %v598_v14, 242.25  ;;  %v461_v9 = vsel %vm455_vm3, %v459_v54, %v445_v0  ;;  %v490_v5 = vadd.f32 %v488_v3, %v481_v23  ;;  %vm486_vm14 = vmand %vm482_vm11, %vm484_vm6 }
 0x184   :  { %v491_v13 = vadd.f32 %v489_v4, %v481_v23  ;;  %v496_v18 = vmul.f32 204.0, %v495_v57  ;;  %v476_v19 = vsel %vm1019_vm9, %v474_v1, %v460_v8  ;;  %v477_v20 = vsel %vm1029_vm7, %v475_v2, %v461_v9 }
 0x185   :  { %v504_v21 = vmul.f32 %v495_v57, %v598_v14  ;;  %v512_v22 = vmul.f32 216.75, %v511_v7  ;;  %v505_v25 = vmul.f32 %v495_v57, %v600_v15  ;;  %v526_v26 = vsub.f32 %v227_v50, %v956_v35 }
 0x186   :  { %v497_v24 = vsub.f32 %v888_v63, %v496_v18  ;;  %v542_v27 = vsub.f32 %v237_v11, %v227_v50  ;;  %v520_v29 = vmul.f32 %v511_v7, %v598_v14  ;;  %v521_v30 = vmul.f32 %v511_v7, %v600_v15 }
 0x187   :  { %v513_v28 = vsub.f32 %v207_v43, %v512_v22  ;;  %vm533_vm12 = vcmp.lt.f32.partialorder %v600_v15, 242.25  ;;  %vm1159_vm13 = vcmp.lt.f32.partialorder %v600_v15, 204.0  ;;  %vm1160_vm2 = vcmp.gt.f32.partialorder %v600_v15, 191.25 }
 0x188   :  { %vm487_vm3 = vmand %vm1160_vm2, %vm1159_vm13  ;;  %v506_v63 = vadd.f32 %v504_v21, %v497_v24  ;;  %v507_v6 = vadd.f32 %v505_v25, %v497_v24  ;;  %v527_v31 = vmul.f32 0.078431375, %v526_v26  ;;  %v543_v32 = vmul.f32 0.078431375, %v542_v27 }
 0x189   :  { %v492_v33 = vsel %vm486_vm14, %v490_v5, %v476_v19  ;;  %v493_v34 = vsel %vm487_vm3, %v491_v13, %v477_v20  ;;  %vm1161_vm11 = vcmp.lt.f32.partialorder %v598_v14, 216.75  ;;  %vm1162_vm6 = vcmp.gt.f32.partialorder %v598_v14, 204.0 }
 0x18a   :  { %vm1056_vm5 = vmand %vm1162_vm6, %vm1161_vm11  ;;  %vm546_vm9 = vcmp.gt.f32.partialorder %v598_v14, 242.25  ;;  %vm548_vm7 = vcmp.lt.f32.partialorder %v598_v14, 255.0  ;;  %v522_v37 = vadd.f32 %v520_v29, %v513_v28  ;;  %v523_v38 = vadd.f32 %v521_v30, %v513_v28 }
 0x18b   :  { %v528_v39 = vmul.f32 229.5, %v527_v31  ;;  %v544_v40 = vmul.f32 242.25, %v543_v32  ;;  %vm1165_vm13 = vcmp.lt.f32.partialorder %v600_v15, 216.75  ;;  %vm1166_vm14 = vcmp.gt.f32.partialorder %v600_v15, 204.0  ;;  %vm519_vm6 = vmand %vm515_vm10, %vm517_vm8 }
 0x18c   :  { %vm1066_vm2 = vmand %vm1166_vm14, %vm1165_vm13  ;;  %v536_v42 = vmul.f32 %v527_v31, %v598_v14  ;;  %v537_v43 = vmul.f32 %v527_v31, %v600_v15  ;;  %v552_v16 = vmul.f32 %v543_v32, %v598_v14  ;;  %v553_v44 = vmul.f32 %v543_v32, %v600_v15 }
 0x18d   :  { %vm1169_vm3 = vcmp.gt.f32.partialorder %v598_v14, 216.75  ;;  %v529_v55 = vsub.f32 %v956_v35, %v528_v39  ;;  %v545_v45 = vsub.f32 %v227_v50, %v544_v40  ;;  %v508_v46 = vsel %vm1056_vm5, %v506_v63, %v492_v33  ;;  %vm534_vm13 = vmand %vm530_vm1, %vm532_vm15 }
 0x18e   :  { %vm518_vm11 = vmand %vm1169_vm3, %vm516_vm4  ;;  %v509_v47 = vsel %vm1066_vm2, %v507_v6, %v493_v34  ;;  %vm547_vm4 = vcmp.gt.f32.partialorder %v600_v15, 242.25  ;;  %vm549_vm14 = vcmp.lt.f32.partialorder %v600_v15, 255.0 }
 0x18f   :  { %v554_v35 = vadd.f32 %v552_v16, %v545_v45  ;;  %v555_v48 = vadd.f32 %v553_v44, %v545_v45  ;;  %vm535_vm5 = vmand %vm531_vm0, %vm533_vm12  ;;  %v538_v49 = vadd.f32 %v536_v42, %v529_v55  ;;  %v539_v52 = vadd.f32 %v537_v43, %v529_v55 }
 0x190   :  { %v524_v53 = vsel %vm518_vm11, %v522_v37, %v508_v46  ;;  %v525_v54 = vsel %vm519_vm6, %v523_v38, %v509_v47  ;;  %vm550_vm8 = vmand %vm546_vm9, %vm548_vm7 }
 0x191   :  { %v540_v56 = vsel %vm534_vm13, %v538_v49, %v524_v53  ;;  %v541_v58 = vsel %vm535_vm5, %v539_v52, %v525_v54  ;;  %vm551_vm10 = vmand %vm547_vm4, %vm549_vm14 }
 0x192   :  { %v556_v59 = vsel %vm550_vm8, %v554_v35, %v540_v56  ;;  %v557_v60 = vsel %vm551_vm10, %v555_v48, %v541_v58 }
 0x193   :  { %v561_v23 = vmax.f32 %v556_v59, %v557_v60  ;;  %v558_v51 = vmin.f32 %v556_v59, %v557_v60 }
 0x195   :  { %562 = vmax.xlane.f32.xlu0 %v561_v23  ;;  %559 = vmin.xlane.f32.xlu1 %v558_v51 }
 0x222   :  { %v563_v15 = vpop.xlane.xlu0 %562  ;;  %v560_v17 = vpop.xlane.xlu1 %559 }
 0x223   :  { %v566_v61 = vsub.f32 %v563_v15, %v560_v17  ;;  %v564_v1 = vsub.f32 %v556_v59, %v560_v17  ;;  %v565_v2 = vsub.f32 %v557_v60, %v560_v17 }
 0x225   :  { %v567_v62 = vadd.f32 1e-05, %v566_v61 }
 0x227   :  { %580 = vrcp.f32 %v567_v62 }
 0x231   :  { %v581_v0 = vpop.eup %580 }
 0x232   :  { %v569_v3 = vmul.f32 255.0, %v581_v0 }
 0x234   :  { %v570_v14 = vmul.f32 %v569_v3, %v564_v1  ;;  %v571_v4 = vmul.f32 %v569_v3, %v565_v2 }
 0x236   :  { %572 = vst [vmem:[%s1108_s1] sm:$0xff] %v570_v14  ;;  %573 = vst [vmem:[%s1108_s1 + $0x8] sm:$0xff] %v571_v4 }

</bundles_post_ra>
